<compile_context>
chip_gen: v7x
topology: tpu7x:2x2x1
jax: 0.10.0
libtpu: 0.0.40
codegen_flags: <defaults>
</compile_context>

<pallas_src>
from typing import NamedTuple, Optional

import jax
import jax.numpy as jnp
from jax.experimental import pallas as pl
from jax.experimental.pallas import tpu as pltpu


class RayBundle(NamedTuple):
    origins: jnp.ndarray                       # (R, 3)
    directions: jnp.ndarray                    # (R, 3)
    sample_points: Optional[jnp.ndarray] = None
    sample_lengths: Optional[jnp.ndarray] = None


def _cdiv(a: int, b: int) -> int:
    return (a + b - 1) // b


def _round_up(x: int, m: int) -> int:
    return ((x + m - 1) // m) * m


def _sampler_kernel(o_ref, d_ref, z_ref, pts_ref):
    # o_ref, d_ref : (TR, 3)   VMEM, f32
    # z_ref        : (1, 3N)   VMEM, f32, z pre-interleaved: [z0,z0,z0, z1,z1,z1, ...]
    # pts_ref      : (TR, 3N)  VMEM; lane l -> sample n = l // 3, channel c = l % 3
    nl = pts_ref.shape[-1]
    c = jax.lax.broadcasted_iota(jnp.int32, (1, nl), 1) % 3

    def gather_channel(ref):
        # Per-lane channel select: two VPU selects + lane splats of (TR, 1) cols.
        x, y, z = ref[:, 0:1], ref[:, 1:2], ref[:, 2:3]
        return jnp.where(c == 0, x, jnp.where(c == 1, y, z))

    o = gather_channel(o_ref)          # (TR, 3N) f32
    d = gather_channel(d_ref)          # (TR, 3N) f32
    pts_ref[...] = (o + z_ref[...] * d).astype(pts_ref.dtype)


def stratified_raysampler(ray_bundle: RayBundle, *, n_pts_per_ray: int,
                          min_depth: float, max_depth: float,
                          ray_tile: int = 1024,
                          out_dtype=jnp.float32) -> RayBundle:
    origins = ray_bundle.origins.astype(jnp.float32)        # (R, 3)
    directions = ray_bundle.directions.astype(jnp.float32)  # (R, 3)
    R = origins.shape[0]
    N = int(n_pts_per_ray)
    NL = 3 * N

    # Single source of truth for z: used both for sample_points (via the kernel)
    # and sample_lengths (wrapper broadcast) -> bitwise-consistent.
    z_vals = jnp.linspace(float(min_depth), float(max_depth), N,
                          dtype=jnp.float32)                 # (N,)
    z_lanes = jnp.repeat(z_vals, 3)[None, :]                 # (1, 3N) interleaved

    # ---- ray tiling --------------------------------------------------------
    # VMEM demand per grid step ~= 2 double-buffered output blocks + ~4 full
    # elementwise intermediates of block size; keep that under ~12 MiB so it
    # fits every generation's scoped-VMEM budget (v5e 16 MiB default, v7x 64 MiB
    # physical) with headroom.
    out_bytes_per_ray = NL * 4
    vmem_budget = 12 * 1024 * 1024
    max_tr = max(8, (vmem_budget // (6 * out_bytes_per_ray)) // 8 * 8)
    tile = max(8, min(int(ray_tile), max_tr))

    num_tiles = _cdiv(R, tile)
    # v7x megacore: make the "parallel" ray axis have >= 2 grid steps (so both
    # TensorCores share the store DMA) whenever it costs no padding.
    if num_tiles == 1 and R > 512 and R % 16 == 0:
        num_tiles = 2
    TR = _round_up(_cdiv(R, num_tiles), 8)   # rays live on sublanes -> mult of 8
    R_pad = num_tiles * TR                    # padding bounded to < 8*num_tiles

    if R_pad != R:
        pad = ((0, R_pad - R), (0, 0))
        origins_p = jnp.pad(origins, pad)
        directions_p = jnp.pad(directions, pad)
    else:
        origins_p, directions_p = origins, directions

    pts_flat = pl.pallas_call(
        _sampler_kernel,
        out_shape=jax.ShapeDtypeStruct((R_pad, NL), out_dtype),
        grid=(num_tiles,),
        in_specs=[
            pl.BlockSpec((TR, 3), lambda i: (i, 0)),
            pl.BlockSpec((TR, 3), lambda i: (i, 0)),
            pl.BlockSpec((1, NL), lambda i: (0, 0)),   # resident z, fetched once
        ],
        out_specs=pl.BlockSpec((TR, NL), lambda i: (i, 0)),
        compiler_params=pltpu.CompilerParams(
            dimension_semantics=("parallel",),
            vmem_limit_bytes=32 * 1024 * 1024),
    )(origins_p, directions_p, z_lanes)

    if R_pad != R:
        pts_flat = pts_flat[:R]
    # Row-major (R, 3N) -> (R, N, 3): identical linear order, so this reshape is
    # layout-preserving (no transpose, no extra HBM traffic).
    sample_points = pts_flat.reshape(R, N, 3)

    # TODO(synk): sample_lengths is identical z per ray; returning the full
    # (R, N, 1) broadcast still materializes R*N*4 bytes at the jit boundary —
    # downstream consumers should take z_vals / fuse this broadcast instead.
    sample_lengths = jnp.broadcast_to(z_vals[None, :, None],
                                      (R, N, 1)).astype(out_dtype)

    return ray_bundle._replace(sample_points=sample_points,
                               sample_lengths=sample_lengths)


def _reference(ray_bundle: RayBundle, *, n_pts_per_ray, min_depth, max_depth):
    z_vals = jnp.linspace(min_depth, max_depth, n_pts_per_ray,
                          dtype=jnp.float32)[:, None]        # (N, 1)
    sample_points = (ray_bundle.origins[:, None, :]
                     + z_vals[None, :, :] * ray_bundle.directions[:, None, :])
    sample_lengths = z_vals[None, :, :] * jnp.ones_like(sample_points[..., :1])
    return sample_points, sample_lengths


if __name__ == "__main__":
    min_depth = 0.1
    max_depth = 5.0

    key = jax.random.PRNGKey(0)
    # Two small configs: one divisible (no padding), one exercising the
    # pad-and-slice path (R not a multiple of 8).
    for num_rays, n_pts in ((200, 128), (77, 64)):
        key, k_o, k_d = jax.random.split(key, 3)
        origins = jax.random.normal(k_o, (num_rays, 3), dtype=jnp.float32)
        directions = jax.random.normal(k_d, (num_rays, 3), dtype=jnp.float32)
        directions = directions / jnp.linalg.norm(directions, axis=-1,
                                                  keepdims=True)

        bundle = RayBundle(origins=origins, directions=directions)

        out = stratified_raysampler(bundle, n_pts_per_ray=n_pts,
                                    min_depth=min_depth, max_depth=max_depth)
        jax.block_until_ready(out.sample_points)
        jax.block_until_ready(out.sample_lengths)

        ref_pts, ref_len = _reference(bundle, n_pts_per_ray=n_pts,
                                      min_depth=min_depth, max_depth=max_depth)

        assert out.sample_points.shape == (num_rays, n_pts, 3)
        assert out.sample_lengths.shape == (num_rays, n_pts, 1)
        assert jnp.allclose(out.sample_points, ref_pts, atol=1e-5, rtol=1e-5)
        assert jnp.allclose(out.sample_lengths, ref_len, atol=1e-5, rtol=1e-5)

    print("KERNEL_OK")
</pallas_src>

<mosaic_0001>
module attributes {stable_mosaic.version = 11 : i64} {
  func.func @_sampler_kernel(%arg0: i32, %arg1: memref<200x3xf32, #tpu.memory_space<vmem>>, %arg2: memref<200x3xf32, #tpu.memory_space<vmem>>, %arg3: memref<1x384xf32, #tpu.memory_space<vmem>>, %arg4: memref<200x384xf32, #tpu.memory_space<vmem>>) attributes {dimension_semantics = [#tpu.dimension_semantics<parallel>], iteration_bounds = array<i64: 1>, scalar_prefetch = 0 : i64, scratch_operands = 0 : i64, tpu.core_type = #tpu.core_type<tc>, window_params = [{transform_indices = @transform_0, window_bounds = array<i64: 200, 3>}, {transform_indices = @transform_1, window_bounds = array<i64: 200, 3>}, {pipeline_mode = #tpu.pipeline_mode<synchronous>, transform_indices = @transform_2, window_bounds = array<i64: 1, 384>}, {transform_indices = @transform_3, window_bounds = array<i64: 200, 384>}]} {
    %0 = tpu.iota {dimensions = array<i32: 1>} : vector<1x384xi32>
    %c3_i32 = arith.constant 3 : i32
    %c0_i32 = arith.constant 0 : i32
    %1 = arith.cmpi eq, %c3_i32, %c0_i32 : i32
    %c1_i32 = arith.constant 1 : i32
    %2 = arith.select %1, %c1_i32, %c3_i32 : i32
    %3 = vector.broadcast %2 : i32 to vector<1x384xi32>
    %4 = arith.remsi %0, %3 : vector<1x384xi32>
    %c0_i32_0 = arith.constant 0 : i32
    %5 = vector.broadcast %c0_i32_0 : i32 to vector<1x384xi32>
    %6 = arith.cmpi ne, %4, %5 : vector<1x384xi32>
    %c0_i32_1 = arith.constant 0 : i32
    %7 = vector.broadcast %c0_i32_1 : i32 to vector<1x384xi32>
    %8 = arith.cmpi slt, %4, %7 : vector<1x384xi32>
    %c0_i32_2 = arith.constant 0 : i32
    %9 = arith.cmpi slt, %2, %c0_i32_2 : i32
    %10 = vector.broadcast %9 : i1 to vector<1x384xi1>
    %11 = vector.broadcast %10 : vector<1x384xi1> to vector<1x384xi1>
    %12 = arith.xori %8, %11 : vector<1x384xi1>
    %13 = arith.andi %12, %6 : vector<1x384xi1>
    %14 = vector.broadcast %2 : i32 to vector<1x384xi32>
    %15 = arith.addi %4, %14 : vector<1x384xi32>
    %16 = arith.select %13, %15, %4 : vector<1x384xi1>, vector<1x384xi32>
    %c0 = arith.constant 0 : index
    %c0_3 = arith.constant 0 : index
    %17 = vector.load %arg1[%c0, %c0_3] : memref<200x3xf32, #tpu.memory_space<vmem>>, vector<200x1xf32>
    %c0_4 = arith.constant 0 : index
    %c1 = arith.constant 1 : index
    %18 = vector.load %arg1[%c0_4, %c1] : memref<200x3xf32, #tpu.memory_space<vmem>>, vector<200x1xf32>
    %c0_5 = arith.constant 0 : index
    %c2 = arith.constant 2 : index
    %19 = vector.load %arg1[%c0_5, %c2] : memref<200x3xf32, #tpu.memory_space<vmem>>, vector<200x1xf32>
    %c0_i32_6 = arith.constant 0 : i32
    %20 = vector.broadcast %c0_i32_6 : i32 to vector<1x384xi32>
    %21 = arith.cmpi eq, %16, %20 : vector<1x384xi32>
    %c1_i32_7 = arith.constant 1 : i32
    %22 = vector.broadcast %c1_i32_7 : i32 to vector<1x384xi32>
    %23 = arith.cmpi eq, %16, %22 : vector<1x384xi32>
    %24 = vector.shape_cast %23 : vector<1x384xi1> to vector<1x384xi1>
    %25 = vector.broadcast %24 : vector<1x384xi1> to vector<200x384xi1>
    %26 = vector.shape_cast %18 : vector<200x1xf32> to vector<200x1xf32>
    %27 = vector.broadcast %26 : vector<200x1xf32> to vector<200x384xf32>
    %28 = vector.shape_cast %19 : vector<200x1xf32> to vector<200x1xf32>
    %29 = vector.broadcast %28 : vector<200x1xf32> to vector<200x384xf32>
    %30 = arith.select %25, %27, %29 : vector<200x384xi1>, vector<200x384xf32>
    %31 = vector.shape_cast %21 : vector<1x384xi1> to vector<1x384xi1>
    %32 = vector.broadcast %31 : vector<1x384xi1> to vector<200x384xi1>
    %33 = vector.shape_cast %17 : vector<200x1xf32> to vector<200x1xf32>
    %34 = vector.broadcast %33 : vector<200x1xf32> to vector<200x384xf32>
    %35 = arith.select %32, %34, %30 : vector<200x384xi1>, vector<200x384xf32>
    %c0_8 = arith.constant 0 : index
    %c0_9 = arith.constant 0 : index
    %36 = vector.load %arg2[%c0_8, %c0_9] : memref<200x3xf32, #tpu.memory_space<vmem>>, vector<200x1xf32>
    %c0_10 = arith.constant 0 : index
    %c1_11 = arith.constant 1 : index
    %37 = vector.load %arg2[%c0_10, %c1_11] : memref<200x3xf32, #tpu.memory_space<vmem>>, vector<200x1xf32>
    %c0_12 = arith.constant 0 : index
    %c2_13 = arith.constant 2 : index
    %38 = vector.load %arg2[%c0_12, %c2_13] : memref<200x3xf32, #tpu.memory_space<vmem>>, vector<200x1xf32>
    %c0_i32_14 = arith.constant 0 : i32
    %39 = vector.broadcast %c0_i32_14 : i32 to vector<1x384xi32>
    %40 = arith.cmpi eq, %16, %39 : vector<1x384xi32>
    %c1_i32_15 = arith.constant 1 : i32
    %41 = vector.broadcast %c1_i32_15 : i32 to vector<1x384xi32>
    %42 = arith.cmpi eq, %16, %41 : vector<1x384xi32>
    %43 = vector.shape_cast %42 : vector<1x384xi1> to vector<1x384xi1>
    %44 = vector.broadcast %43 : vector<1x384xi1> to vector<200x384xi1>
    %45 = vector.shape_cast %37 : vector<200x1xf32> to vector<200x1xf32>
    %46 = vector.broadcast %45 : vector<200x1xf32> to vector<200x384xf32>
    %47 = vector.shape_cast %38 : vector<200x1xf32> to vector<200x1xf32>
    %48 = vector.broadcast %47 : vector<200x1xf32> to vector<200x384xf32>
    %49 = arith.select %44, %46, %48 : vector<200x384xi1>, vector<200x384xf32>
    %50 = vector.shape_cast %40 : vector<1x384xi1> to vector<1x384xi1>
    %51 = vector.broadcast %50 : vector<1x384xi1> to vector<200x384xi1>
    %52 = vector.shape_cast %36 : vector<200x1xf32> to vector<200x1xf32>
    %53 = vector.broadcast %52 : vector<200x1xf32> to vector<200x384xf32>
    %54 = arith.select %51, %53, %49 : vector<200x384xi1>, vector<200x384xf32>
    %c0_16 = arith.constant 0 : index
    %c0_17 = arith.constant 0 : index
    %55 = vector.load %arg3[%c0_16, %c0_17] : memref<1x384xf32, #tpu.memory_space<vmem>>, vector<1x384xf32>
    %56 = vector.broadcast %55 : vector<1x384xf32> to vector<200x384xf32>
    %57 = arith.mulf %56, %54 : vector<200x384xf32>
    %58 = arith.addf %35, %57 : vector<200x384xf32>
    %c0_18 = arith.constant 0 : index
    %c0_19 = arith.constant 0 : index
    %59 = vector.load %arg4[%c0_18, %c0_19] : memref<200x384xf32, #tpu.memory_space<vmem>>, vector<200x384xf32>
    tpu.vector_store %arg4[%c0_18, %c0_19], %58 {strides = array<i32>} : memref<200x384xf32, #tpu.memory_space<vmem>>, vector<200x384xf32>,
    return
  }
  func.func @transform_0(%arg0: i32) -> (i32, i32) {
    %c0_i32 = arith.constant 0 : i32
    %c0_i32_0 = arith.constant 0 : i32
    return %arg0, %c0_i32 : i32, i32
  }
  func.func @transform_1(%arg0: i32) -> (i32, i32) {
    %c0_i32 = arith.constant 0 : i32
    %c0_i32_0 = arith.constant 0 : i32
    return %arg0, %c0_i32 : i32, i32
  }
  func.func @transform_2(%arg0: i32) -> (i32, i32) {
    %c0_i32 = arith.constant 0 : i32
    %c0_i32_0 = arith.constant 0 : i32
    %c0_i32_1 = arith.constant 0 : i32
    return %c0_i32, %c0_i32_0 : i32, i32
  }
  func.func @transform_3(%arg0: i32) -> (i32, i32) {
    %c0_i32 = arith.constant 0 : i32
    %c0_i32_0 = arith.constant 0 : i32
    return %arg0, %c0_i32 : i32, i32
  }
}

</mosaic_0001>

<bundles_post_ra>
// kernel: tpu_custom_call.1
= control target key start
LH: loop header
LB: loop body
LE: loop exit
PB: predicated region body
PF: predicated region fallthrough
CT: control target
= control target key end

     0   :  { %v1388_v2 = vmov 1   ;;  %s3770_s0 = inlined_call_operand.vmem [shape: f32[200,3], index: 0, kind: input, shape index: {}]   ;;  %s3771_s1 = inlined_call_operand.vmem [shape: f32[200,3], index: 1, kind: input, shape index: {}]   ;;  %s3772_s2 = inlined_call_operand.vmem [shape: f32[1,384], index: 2, kind: input, shape index: {}]   ;;  %s3773_s3 = inlined_call_operand.hbm [shape: f32[200,384], index: 3, kind: output, shape index: {}]  }
   0x1   :  { %v1417_v0 = vld [vmem:[%s3770_s0 + $0x10] sm:$0xff]  ;;  %v1422_v1 = vld [vmem:[%s3770_s0] sm:$0xff]  ;;  %1356 = vset.pattern.permute.xlu1 %v1388_v2  ;;  %1355 = vset.pattern.permute.xlu0 %v1388_v2  ;;  %v1431_v3 = vld [vmem:[%s3770_s0 + $0x18] sm:$0xff] }
   0x2   :  { %116 = vperm.xlu1 %1356, %v1417_v0   ;;  %106 = vperm.xlu0 %1355, %v1422_v1   ;;  %v1436_v4 = vld [vmem:[%s3770_s0 + $0x8] sm:$0xff]  ;;  %v1448_v6 = vld [vmem:[%s3770_s0 + $0x20] sm:$0xff]  ;;  %v1455_v7 = vld [vmem:[%s3770_s0 + $0x38] sm:$0xff] }
   0x3   :  { %v1443_v5 = vld [vmem:[%s3770_s0 + $0x28] sm:$0xff]  ;;  %v1460_v8 = vld [vmem:[%s3770_s0 + $0x30] sm:$0xff] }
   0x6   :  { %121 = vperm.xlu1 %1356, %v1431_v3   ;;  %111 = vperm.xlu0 %1355, %v1436_v4  }
   0xa   :  { %131 = vperm.xlu1 %1356, %v1443_v5   ;;  %126 = vperm.xlu0 %1355, %v1448_v6  }
   0xb   :  { %8 = vsyncpa [#allocation3], 0  ;;  %v1467_v9 = vld [vmem:[%s3770_s0 + $0x48] sm:$0xff]  ;;  %v1472_v10 = vld [vmem:[%s3770_s0 + $0x40] sm:$0xff]  ;;  %v3774_v26 = vmov 2   ;;  %v3775_v39 = vmov 0  }
   0xc   :  { %v1479_v11 = vld [vmem:[%s3770_s0 + $0x58] sm:$0xff]  ;;  %v1484_v12 = vld [vmem:[%s3770_s0 + $0x50] sm:$0xff]  ;;  %v1491_v13 = vld [vmem:[%s3770_s0 + $0x68] sm:$0xff] }
   0xd   :  { %v1496_v14 = vld [vmem:[%s3770_s0 + $0x60] sm:$0xff]  ;;  %v1503_v15 = vld [vmem:[%s3770_s0 + $0x78] sm:$0xff]  ;;  %v1508_v16 = vld [vmem:[%s3770_s0 + $0x70] sm:$0xff] }
   0xe   :  { %141 = vperm.xlu1 %1356, %v1455_v7   ;;  %136 = vperm.xlu0 %1355, %v1460_v8   ;;  %v1515_v17 = vld [vmem:[%s3770_s0 + $0x88] sm:$0xff]  ;;  %v1520_v18 = vld [vmem:[%s3770_s0 + $0x80] sm:$0xff]  ;;  %v1527_v19 = vld [vmem:[%s3770_s0 + $0x98] sm:$0xff] }
   0xf   :  { %v1532_v20 = vld [vmem:[%s3770_s0 + $0x90] sm:$0xff]  ;;  %v1539_v21 = vld [vmem:[%s3770_s0 + $0xa8] sm:$0xff]  ;;  %v1544_v22 = vld [vmem:[%s3770_s0 + $0xa0] sm:$0xff] }
  0x10   :  { %v1551_v23 = vld [vmem:[%s3770_s0 + $0xb8] sm:$0xff]  ;;  %v1556_v24 = vld [vmem:[%s3770_s0 + $0xb0] sm:$0xff]  ;;  %v1563_v25 = vld [vmem:[%s3770_s0 + $0xc0] sm:$0xff] }
  0x11   :  { %v1571_v27 = vld [vmem:[%s3771_s1 + $0x8] sm:$0xff]  ;;  %v1578_v28 = vld [vmem:[%s3771_s1 + $0x20] sm:$0xff]  ;;  %v1585_v29 = vld [vmem:[%s3771_s1 + $0x30] sm:$0xff] }
  0x12   :  { %151 = vperm.xlu1 %1356, %v1467_v9   ;;  %146 = vperm.xlu0 %1355, %v1472_v10   ;;  %v1592_v30 = vld [vmem:[%s3771_s1 + $0x40] sm:$0xff]  ;;  %v1599_v31 = vld [vmem:[%s3771_s1 + $0x50] sm:$0xff]  ;;  %v1734_v60 = vld [vmem:[%s3771_s1 + $0x18] sm:$0xff] }
  0x13   :  { %v1606_v32 = vld [vmem:[%s3771_s1 + $0x60] sm:$0xff]  ;;  %v1613_v33 = vld [vmem:[%s3771_s1 + $0x70] sm:$0xff]  ;;  %v1745_v63 = vld [vmem:[%s3771_s1 + $0x28] sm:$0xff] }
  0x14   :  { %v1620_v34 = vld [vmem:[%s3771_s1 + $0x80] sm:$0xff]  ;;  %v1627_v35 = vld [vmem:[%s3771_s1 + $0x90] sm:$0xff] }
  0x15   :  { %v1634_v36 = vld [vmem:[%s3771_s1 + $0xa0] sm:$0xff]  ;;  %v1641_v37 = vld [vmem:[%s3771_s1 + $0xb0] sm:$0xff] }
  0x16   :  { %161 = vperm.xlu1 %1356, %v1479_v11   ;;  %156 = vperm.xlu0 %1355, %v1484_v12   ;;  %v1648_v38 = vld [vmem:[%s3771_s1 + $0xc0] sm:$0xff]  ;;  %v1723_v57 = vld [vmem:[%s3771_s1 + $0x10] sm:$0xff] }
  0x17   :  { %v1711_v54 = vld [vmem:[%s3771_s1] sm:$0xff] }
  0x1a   :  { %171 = vperm.xlu1 %1356, %v1491_v13   ;;  %166 = vperm.xlu0 %1355, %v1496_v14  }
  0x1e   :  { %181 = vperm.xlu1 %1356, %v1503_v15   ;;  %176 = vperm.xlu0 %1355, %v1508_v16  }
  0x22   :  { %191 = vperm.xlu1 %1356, %v1515_v17   ;;  %186 = vperm.xlu0 %1355, %v1520_v18  }
  0x26   :  { %201 = vperm.xlu1 %1356, %v1527_v19   ;;  %196 = vperm.xlu0 %1355, %v1532_v20  }
  0x2a   :  { %211 = vperm.xlu1 %1356, %v1539_v21   ;;  %206 = vperm.xlu0 %1355, %v1544_v22  }
  0x2e   :  { %221 = vperm.xlu1 %1356, %v1551_v23   ;;  %216 = vperm.xlu0 %1355, %v1556_v24  }
  0x32   :  { %1357 = vset.pattern.permute.xlu1 %v3774_v26  ;;  %226 = vperm.xlu0 %1355, %v1563_v25  }
  0x33   :  { %230 = vperm.xlu1 %1357, %v1422_v1  }
  0x36   :  { %617 = vperm.xlu0 %1355, %v1571_v27  }
  0x37   :  { %238 = vperm.xlu1 %1357, %v1417_v0  }
  0x3a   :  { %632 = vperm.xlu0 %1355, %v1578_v28  }
  0x3b   :  { %242 = vperm.xlu1 %1357, %v1431_v3  }
  0x3e   :  { %642 = vperm.xlu0 %1355, %v1585_v29  }
  0x3f   :  { %250 = vperm.xlu1 %1357, %v1443_v5  }
  0x42   :  { %652 = vperm.xlu0 %1355, %v1592_v30  }
  0x43   :  { %258 = vperm.xlu1 %1357, %v1455_v7  }
  0x46   :  { %662 = vperm.xlu0 %1355, %v1599_v31  }
  0x47   :  { %266 = vperm.xlu1 %1357, %v1467_v9  }
  0x4a   :  { %672 = vperm.xlu0 %1355, %v1606_v32  }
  0x4b   :  { %274 = vperm.xlu1 %1357, %v1479_v11  }
  0x4e   :  { %682 = vperm.xlu0 %1355, %v1613_v33  }
  0x4f   :  { %282 = vperm.xlu1 %1357, %v1491_v13  }
  0x52   :  { %692 = vperm.xlu0 %1355, %v1620_v34  }
  0x53   :  { %290 = vperm.xlu1 %1357, %v1503_v15  }
  0x56   :  { %702 = vperm.xlu0 %1355, %v1627_v35  }
  0x57   :  { %298 = vperm.xlu1 %1357, %v1515_v17  }
  0x5a   :  { %712 = vperm.xlu0 %1355, %v1634_v36  }
  0x5b   :  { %306 = vperm.xlu1 %1357, %v1527_v19  }
  0x5e   :  { %722 = vperm.xlu0 %1355, %v1641_v37  }
  0x5f   :  { %314 = vperm.xlu1 %1357, %v1539_v21  }
  0x62   :  { %732 = vperm.xlu0 %1355, %v1648_v38  }
  0x63   :  { %322 = vperm.xlu1 %1357, %v1551_v23  }
  0x66   :  { %1360 = vset.pattern.permute.xlu0 %v3774_v26  ;;  %v1800_v26 = vld [vmem:[%s3771_s1 + $0x78] sm:$0xff] }
  0x67   :  { %1358 = vset.pattern.permute.xlu1 %v3775_v39  ;;  %234 = vperm.xlu0 %1360, %v1436_v4  }
  0x68   :  { %411 = vperm.xlu1 %1358, %v1422_v1  }
  0x6b   :  { %246 = vperm.xlu0 %1360, %v1448_v6  }
  0x6c   :  { %419 = vperm.xlu1 %1358, %v1417_v0  }
  0x6f   :  { %254 = vperm.xlu0 %1360, %v1460_v8  }
  0x70   :  { %423 = vperm.xlu1 %1358, %v1431_v3  }
  0x73   :  { %262 = vperm.xlu0 %1360, %v1472_v10  }
  0x74   :  { %431 = vperm.xlu1 %1358, %v1443_v5  }
  0x77   :  { %270 = vperm.xlu0 %1360, %v1484_v12  }
  0x78   :  { %439 = vperm.xlu1 %1358, %v1455_v7   ;;  %v1767_v7 = vld [vmem:[%s3771_s1 + $0x48] sm:$0xff] }
  0x7b   :  { %278 = vperm.xlu0 %1360, %v1496_v14  }
  0x7c   :  { %447 = vperm.xlu1 %1358, %v1467_v9  }
  0x7f   :  { %286 = vperm.xlu0 %1360, %v1508_v16  }
  0x80   :  { %455 = vperm.xlu1 %1358, %v1479_v11  }
  0x81   :  { %v1668_v40 = vpop.permute.xlu1 %116  ;;  %v1670_v41 = vpop.permute.xlu0 %106 }
  0x83   :  { %294 = vperm.xlu0 %1360, %v1520_v18  }
  0x84   :  { %463 = vperm.xlu1 %1358, %v1491_v13   ;;  %v1778_v13 = vld [vmem:[%s3771_s1 + $0x58] sm:$0xff] }
  0x85   :  { %v1674_v42 = vpop.permute.xlu1 %121  ;;  %v1676_v43 = vpop.permute.xlu0 %111 }
  0x87   :  { %302 = vperm.xlu0 %1360, %v1532_v20  }
  0x88   :  { %471 = vperm.xlu1 %1358, %v1503_v15  }
  0x89   :  { %v1680_v44 = vpop.permute.xlu1 %131  ;;  %v1682_v45 = vpop.permute.xlu0 %126 }
  0x8a   :  { %3842 = vst [vmem:[#allocation5_spill] sm:$0xff] %v1682_v45 }
  0x8b   :  { %310 = vperm.xlu0 %1360, %v1544_v22  }
  0x8c   :  { %479 = vperm.xlu1 %1358, %v1515_v17  }
  0x8d   :  { %v1686_v46 = vpop.permute.xlu1 %141  ;;  %v1688_v47 = vpop.permute.xlu0 %136 }
  0x8e   :  { %3843 = vst [vmem:[#allocation6_spill] sm:$0xff] %v1688_v47 }
  0x8f   :  { %318 = vperm.xlu0 %1360, %v1556_v24  }
  0x90   :  { %487 = vperm.xlu1 %1358, %v1527_v19   ;;  %v1789_v19 = vld [vmem:[%s3771_s1 + $0x68] sm:$0xff] }
  0x91   :  { %v1692_v48 = vpop.permute.xlu1 %151  ;;  %v1694_v49 = vpop.permute.xlu0 %146 }
  0x92   :  { %3844 = vst [vmem:[#allocation7_spill] sm:$0xff] %v1694_v49 }
  0x93   :  { %326 = vperm.xlu0 %1360, %v1563_v25  }
  0x94   :  { %495 = vperm.xlu1 %1358, %v1539_v21  }
  0x95   :  { %v1698_v50 = vpop.permute.xlu1 %161  ;;  %v1700_v51 = vpop.permute.xlu0 %156 }
  0x96   :  { %3845 = vst [vmem:[#allocation8_spill] sm:$0xff] %v1700_v51 }
  0x97   :  { %740 = vperm.xlu0 %1360, %v1571_v27  }
  0x98   :  { %503 = vperm.xlu1 %1358, %v1551_v23  }
  0x99   :  { %v1704_v52 = vpop.permute.xlu1 %171  ;;  %v1706_v53 = vpop.permute.xlu0 %166 }
  0x9a   :  { %3846 = vst [vmem:[#allocation9_spill] sm:$0xff] %v1706_v53 }
  0x9b   :  { %752 = vperm.xlu0 %1360, %v1578_v28  }
  0x9c   :  { %1359 = vset.pattern.permute.xlu1 %v1388_v2  ;;  %v1756_v2 = vld [vmem:[%s3771_s1 + $0x38] sm:$0xff] }
  0x9d   :  { %v1715_v55 = vpop.permute.xlu1 %181  ;;  %612 = vperm.xlu1 %1359, %v1711_v54   ;;  %v1718_v56 = vpop.permute.xlu0 %176 }
  0x9e   :  { %3847 = vst [vmem:[#allocation10_spill] sm:$0xff] %v1718_v56 }
  0x9f   :  { %760 = vperm.xlu0 %1360, %v1585_v29  }
  0xa1   :  { %v1726_v58 = vpop.permute.xlu1 %191  ;;  %622 = vperm.xlu1 %1359, %v1723_v57   ;;  %v1729_v59 = vpop.permute.xlu0 %186 }
  0xa2   :  { %3848 = vst [vmem:[#allocation11_spill] sm:$0xff] %v1729_v59  ;;  %v1833_v59 = vld [vmem:[%s3771_s1 + $0xa8] sm:$0xff] }
  0xa3   :  { %768 = vperm.xlu0 %1360, %v1592_v30  }
  0xa5   :  { %v1737_v61 = vpop.permute.xlu1 %201  ;;  %627 = vperm.xlu1 %1359, %v1734_v60   ;;  %v1740_v62 = vpop.permute.xlu0 %196 }
  0xa6   :  { %3849 = vst [vmem:[#allocation12_spill] sm:$0xff] %v1740_v62 }
  0xa7   :  { %776 = vperm.xlu0 %1360, %v1599_v31  }
  0xa9   :  { %v1748_v0 = vpop.permute.xlu1 %211  ;;  %637 = vperm.xlu1 %1359, %v1745_v63   ;;  %v1751_v1 = vpop.permute.xlu0 %206 }
  0xaa   :  { %3850 = vst [vmem:[#allocation13_spill] sm:$0xff] %v1751_v1  ;;  %v1822_v1 = vld [vmem:[%s3771_s1 + $0x98] sm:$0xff] }
  0xab   :  { %784 = vperm.xlu0 %1360, %v1606_v32  }
  0xad   :  { %v1759_v3 = vpop.permute.xlu1 %221  ;;  %647 = vperm.xlu1 %1359, %v1756_v2   ;;  %v1762_v5 = vpop.permute.xlu0 %216 }
  0xae   :  { %3851 = vst [vmem:[#allocation14_spill] sm:$0xff] %v1759_v3  ;;  %3852 = vst [vmem:[#allocation15_spill] sm:$0xff] %v1762_v5 }
  0xaf   :  { %792 = vperm.xlu0 %1360, %v1613_v33  }
  0xb1   :  { %657 = vperm.xlu1 %1359, %v1767_v7   ;;  %v1771_v9 = vpop.permute.xlu0 %226 }
  0xb2   :  { %3853 = vst [vmem:[#allocation16_spill] sm:$0xff] %v1771_v9  ;;  %v1773_v11 = vpop.permute.xlu1 %230  ;;  %v1811_v9 = vld [vmem:[%s3771_s1 + $0x88] sm:$0xff] }
  0xb3   :  { %800 = vperm.xlu0 %1360, %v1620_v34  }
  0xb5   :  { %667 = vperm.xlu1 %1359, %v1778_v13   ;;  %v1782_v15 = vpop.permute.xlu0 %617 }
  0xb6   :  { %3854 = vst [vmem:[#allocation17_spill] sm:$0xff] %v1782_v15  ;;  %v1784_v17 = vpop.permute.xlu1 %238 }
  0xb7   :  { %808 = vperm.xlu0 %1360, %v1627_v35  }
  0xb9   :  { %677 = vperm.xlu1 %1359, %v1789_v19   ;;  %v1793_v21 = vpop.permute.xlu0 %632 }
  0xba   :  { %3855 = vst [vmem:[#allocation18_spill] sm:$0xff] %v1793_v21  ;;  %v1795_v23 = vpop.permute.xlu1 %242 }
  0xbb   :  { %816 = vperm.xlu0 %1360, %v1634_v36  }
  0xbd   :  { %687 = vperm.xlu1 %1359, %v1800_v26   ;;  %v1804_v39 = vpop.permute.xlu0 %642 }
  0xbe   :  { %3856 = vst [vmem:[#allocation19_spill] sm:$0xff] %v1804_v39  ;;  %v1806_v15 = vpop.permute.xlu1 %250 }
  0xbf   :  { %824 = vperm.xlu0 %1360, %v1641_v37  }
  0xc1   :  { %697 = vperm.xlu1 %1359, %v1811_v9   ;;  %v1815_v21 = vpop.permute.xlu0 %652 }
  0xc2   :  { %3857 = vst [vmem:[#allocation20_spill] sm:$0xff] %v1815_v21  ;;  %v1817_v5 = vpop.permute.xlu1 %258  ;;  %v3859_v21 = vmov 0  }
  0xc3   :  { %832 = vperm.xlu0 %1360, %v1648_v38  }
  0xc5   :  { %707 = vperm.xlu1 %1359, %v1822_v1   ;;  %v1826_v39 = vpop.permute.xlu0 %662 }
  0xc6   :  { %3858 = vst [vmem:[#allocation21_spill] sm:$0xff] %v1826_v39  ;;  %v1828_v62 = vpop.permute.xlu1 %266  ;;  %v1845_v39 = vld [vmem:[%s3771_s1 + $0xb8] sm:$0xff] }
  0xc7   :  { %1362 = vset.pattern.permute.xlu0 %v3859_v21 }
  0xc8   :  { %415 = vperm.xlu0 %1362, %v1436_v4   ;;  %v3862_v4 = vmov 2  }
  0xc9   :  { %717 = vperm.xlu1 %1359, %v1833_v59   ;;  %v1838_v56 = vpop.permute.xlu0 %672 }
  0xca   :  { %3860 = vst [vmem:[#allocation22_spill] sm:$0xff] %v1838_v56  ;;  %v1840_v53 = vpop.permute.xlu1 %274 }
  0xcc   :  { %427 = vperm.xlu0 %1362, %v1448_v6  }
  0xcd   :  { %727 = vperm.xlu1 %1359, %v1845_v39   ;;  %v1849_v51 = vpop.permute.xlu0 %682 }
  0xce   :  { %3861 = vst [vmem:[#allocation23_spill] sm:$0xff] %v1849_v51  ;;  %v1851_v49 = vpop.permute.xlu1 %282 }
  0xd0   :  { %435 = vperm.xlu0 %1362, %v1460_v8  }
  0xd1   :  { %1361 = vset.pattern.permute.xlu1 %v3862_v4  ;;  %v1855_v56 = vpop.permute.xlu0 %692 }
  0xd2   :  { %3863 = vst [vmem:[#allocation24_spill] sm:$0xff] %v1855_v56  ;;  %736 = vperm.xlu1 %1361, %v1711_v54   ;;  %v1858_v47 = vpop.permute.xlu1 %290 }
  0xd4   :  { %443 = vperm.xlu0 %1362, %v1472_v10  }
  0xd5   :  { %v1861_v45 = vpop.permute.xlu0 %702 }
  0xd6   :  { %3864 = vst [vmem:[#allocation25_spill] sm:$0xff] %v1861_v45  ;;  %744 = vperm.xlu1 %1361, %v1723_v57   ;;  %v1864_v6 = vpop.permute.xlu1 %298 }
  0xd8   :  { %451 = vperm.xlu0 %1362, %v1484_v12  }
  0xd9   :  { %v1867_v51 = vpop.permute.xlu0 %712 }
  0xda   :  { %3865 = vst [vmem:[#allocation26_spill] sm:$0xff] %v1867_v51  ;;  %748 = vperm.xlu1 %1361, %v1734_v60   ;;  %v1870_v8 = vpop.permute.xlu1 %306 }
  0xdc   :  { %459 = vperm.xlu0 %1362, %v1496_v14  }
  0xdd   :  { %v1873_v4 = vpop.permute.xlu0 %722 }
  0xde   :  { %3866 = vst [vmem:[#allocation27_spill] sm:$0xff] %v1873_v4  ;;  %756 = vperm.xlu1 %1361, %v1745_v63   ;;  %v1876_v10 = vpop.permute.xlu1 %314 }
  0xe0   :  { %467 = vperm.xlu0 %1362, %v1508_v16  }
  0xe1   :  { %v1879_v45 = vpop.permute.xlu0 %732 }
  0xe2   :  { %3867 = vst [vmem:[#allocation28_spill] sm:$0xff] %v1879_v45  ;;  %764 = vperm.xlu1 %1361, %v1756_v2   ;;  %v1882_v12 = vpop.permute.xlu1 %322 }
  0xe3   :  { %3868 = vst [vmem:[#allocation29_spill] sm:$0xff] %v1882_v12 }
  0xe4   :  { %475 = vperm.xlu0 %1362, %v1520_v18  }
  0xe6   :  { %772 = vperm.xlu1 %1361, %v1767_v7   ;;  %v1886_v51 = vpop.permute.xlu0 %234 }
  0xe7   :  { %v1888_v14 = vpop.permute.xlu1 %411 }
  0xe8   :  { %483 = vperm.xlu0 %1362, %v1532_v20  }
  0xea   :  { %780 = vperm.xlu1 %1361, %v1778_v13   ;;  %v1892_v4 = vpop.permute.xlu0 %246 }
  0xeb   :  { %v1894_v16 = vpop.permute.xlu1 %419 }
  0xec   :  { %3869 = vst [vmem:[#allocation30_spill] sm:$0xff] %v1894_v16  ;;  %491 = vperm.xlu0 %1362, %v1544_v22  }
  0xee   :  { %788 = vperm.xlu1 %1361, %v1789_v19   ;;  %v1898_v45 = vpop.permute.xlu0 %254 }
  0xef   :  { %v1900_v18 = vpop.permute.xlu1 %423 }
  0xf0   :  { %3870 = vst [vmem:[#allocation31_spill] sm:$0xff] %v1900_v18  ;;  %499 = vperm.xlu0 %1362, %v1556_v24  }
  0xf2   :  { %796 = vperm.xlu1 %1361, %v1800_v26   ;;  %v1904_v56 = vpop.permute.xlu0 %262 }
  0xf3   :  { %v1906_v20 = vpop.permute.xlu1 %431 }
  0xf4   :  { %3871 = vst [vmem:[#allocation32_spill] sm:$0xff] %v1906_v20  ;;  %507 = vperm.xlu0 %1362, %v1563_v25  }
  0xf6   :  { %804 = vperm.xlu1 %1361, %v1811_v9   ;;  %v1910_v16 = vpop.permute.xlu0 %270 }
  0xf7   :  { %v1912_v22 = vpop.permute.xlu1 %439 }
  0xf8   :  { %3872 = vst [vmem:[#allocation33_spill] sm:$0xff] %v1912_v22  ;;  %915 = vperm.xlu0 %1362, %v1571_v27  }
  0xfa   :  { %812 = vperm.xlu1 %1361, %v1822_v1   ;;  %v1916_v18 = vpop.permute.xlu0 %278 }
  0xfb   :  { %v1918_v24 = vpop.permute.xlu1 %447 }
  0xfc   :  { %3873 = vst [vmem:[#allocation34_spill] sm:$0xff] %v1918_v24  ;;  %927 = vperm.xlu0 %1362, %v1578_v28  }
  0xfe   :  { %820 = vperm.xlu1 %1361, %v1833_v59   ;;  %v1922_v20 = vpop.permute.xlu0 %286 }
  0xff   :  { %v1924_v25 = vpop.permute.xlu1 %455 }
 0x100   :  { %3874 = vst [vmem:[#allocation35_spill] sm:$0xff] %v1924_v25  ;;  %935 = vperm.xlu0 %1362, %v1585_v29  }
 0x102   :  { %828 = vperm.xlu1 %1361, %v1845_v39   ;;  %v1928_v22 = vpop.permute.xlu0 %294 }
 0x103   :  { %v1930_v27 = vpop.permute.xlu1 %463 }
 0x104   :  { %3875 = vst [vmem:[#allocation36_spill] sm:$0xff] %v1930_v27  ;;  %943 = vperm.xlu0 %1362, %v1592_v30  }
 0x106   :  { %1363 = vset.pattern.permute.xlu1 %v3859_v21  ;;  %v1934_v24 = vpop.permute.xlu0 %302  ;;  %v3810_v21 = vlaneseq }
 0x107   :  { %911 = vperm.xlu1 %1363, %v1711_v54   ;;  %v1937_v28 = vpop.permute.xlu1 %471 }
 0x108   :  { %951 = vperm.xlu0 %1362, %v1599_v31  }
 0x10a   :  { %v1940_v25 = vpop.permute.xlu0 %310 }
 0x10b   :  { %919 = vperm.xlu1 %1363, %v1723_v57   ;;  %v1943_v29 = vpop.permute.xlu1 %479 }
 0x10c   :  { %959 = vperm.xlu0 %1362, %v1606_v32  }
 0x10e   :  { %v1946_v27 = vpop.permute.xlu0 %318 }
 0x10f   :  { %923 = vperm.xlu1 %1363, %v1734_v60   ;;  %v1949_v30 = vpop.permute.xlu1 %487 }
 0x110   :  { %967 = vperm.xlu0 %1362, %v1613_v33  }
 0x112   :  { %v1952_v54 = vpop.permute.xlu0 %326 }
 0x113   :  { %931 = vperm.xlu1 %1363, %v1745_v63   ;;  %v1955_v31 = vpop.permute.xlu1 %495 }
 0x114   :  { %3876 = vst [vmem:[#allocation37_spill] sm:$0xff] %v1955_v31  ;;  %975 = vperm.xlu0 %1362, %v1620_v34   ;;  %v16_v34 = vand.u32 127, %v3810_v21 }
 0x116   :  { %v1958_v57 = vpop.permute.xlu0 %740 }
 0x117   :  { %939 = vperm.xlu1 %1363, %v1756_v2   ;;  %v1961_v32 = vpop.permute.xlu1 %503 }
 0x118   :  { %3877 = vst [vmem:[#allocation38_spill] sm:$0xff] %v1961_v32  ;;  %983 = vperm.xlu0 %1362, %v1627_v35   ;;  %v17_v32 = vadd.s32 128, %v16_v34 }
 0x11a   :  { %v1964_v60 = vpop.permute.xlu0 %752 }
 0x11b   :  { %3878 = vst [vmem:[#allocation39_spill] sm:$0xff] %v1964_v60  ;;  %947 = vperm.xlu1 %1363, %v1767_v7   ;;  %v18_v7 = vadd.s32 256, %v16_v34 }
 0x11c   :  { %v1967_v33 = vpop.permute.xlu1 %612  ;;  %991 = vperm.xlu0 %1362, %v1634_v36  }
 0x11d   :  { %3879 = vst [vmem:[#allocation40_spill] sm:$0xff] %v1967_v33  ;;  %v1983_v36 = vmul.u32.u64.low 2863311531, %v16_v34  ;;  %v1984_v33 = vmul.u32.u64.high 2863311531, %v16_v34, %v1983_v36 }
 0x11e   :  { %v1970_v63 = vpop.permute.xlu0 %760 }
 0x11f   :  { %3880 = vst [vmem:[#allocation41_spill] sm:$0xff] %v1970_v63  ;;  %955 = vperm.xlu1 %1363, %v1778_v13   ;;  %v1988_v13 = vmul.u32.u64.low 2863311531, %v17_v32  ;;  %v1989_v63 = vmul.u32.u64.high 2863311531, %v17_v32, %v1988_v13  ;;  %v25_v36 = vshrl.u32 %v1984_v33, 1 }
 0x120   :  { %v1974_v2 = vpop.permute.xlu1 %622  ;;  %999 = vperm.xlu0 %1362, %v1641_v37  }
 0x121   :  { %3881 = vst [vmem:[#allocation42_spill] sm:$0xff] %v1974_v2  ;;  %v1992_v37 = vmul.u32.u64.low 2863311531, %v18_v7  ;;  %v1993_v2 = vmul.u32.u64.high 2863311531, %v18_v7, %v1992_v37 }
 0x122   :  { %v1977_v35 = vpop.permute.xlu0 %768  ;;  %v26_v37 = vmul.u32 3, %v25_v36 }
 0x123   :  { %3882 = vst [vmem:[#allocation43_spill] sm:$0xff] %v1977_v35  ;;  %963 = vperm.xlu1 %1363, %v1789_v19  }
 0x124   :  { %v1980_v31 = vpop.permute.xlu1 %627  ;;  %1007 = vperm.xlu0 %1362, %v1648_v38   ;;  %v27_v33 = vsub.s32 %v16_v34, %v26_v37 }
 0x125   :  { %3883 = vst [vmem:[#allocation44_spill] sm:$0xff] %v1980_v31 }
 0x126   :  { %v1986_v21 = vpop.permute.xlu0 %776  ;;  %vm52_vm0 = vcmp.ne.s32.totalorder %v27_v33, 0  ;;  %vm55_vm1 = vcmp.lt.s32.totalorder %v27_v33, 0 }
 0x127   :  { %3884 = vst [vmem:[#allocation45_spill] sm:$0xff] %v1986_v21  ;;  %971 = vperm.xlu1 %1363, %v1800_v26   ;;  %v36_v21 = vshrl.u32 %v1989_v63, 1  ;;  %v47_v26 = vshrl.u32 %v1993_v2, 1  ;;  %vm58_vm6 = vmand %vm55_vm1, %vm52_vm0 }
 0x128   :  { %v1995_v35 = vpop.permute.xlu1 %637 }
 0x129   :  { %3885 = vst [vmem:[#allocation46_spill] sm:$0xff] %v1995_v35 }
 0x12a   :  { %v1997_v19 = vpop.permute.xlu0 %784 }
 0x12b   :  { %3886 = vst [vmem:[#allocation47_spill] sm:$0xff] %v1997_v19  ;;  %979 = vperm.xlu1 %1363, %v1811_v9   ;;  %v37_v19 = vmul.u32 3, %v36_v21  ;;  %v48_v9 = vmul.u32 3, %v47_v26  ;;  %v61_v21 = vadd.s32 3, %v27_v33 }
 0x12c   :  { %v2000_v38 = vpop.permute.xlu1 %647 }
 0x12d   :  { %3887 = vst [vmem:[#allocation48_spill] sm:$0xff] %v2000_v38 }
 0x12e   :  { %v2003_v31 = vpop.permute.xlu0 %792 }
 0x12f   :  { %3888 = vst [vmem:[#allocation49_spill] sm:$0xff] %v2003_v31  ;;  %987 = vperm.xlu1 %1363, %v1822_v1   ;;  %v38_v31 = vsub.s32 %v17_v32, %v37_v19  ;;  %v49_v1 = vsub.s32 %v18_v7, %v48_v9  ;;  %v2028_v7 = vsel %vm58_vm6, %v61_v21, %v27_v33 }
 0x130   :  { %v2008_v13 = vpop.permute.xlu1 %657  ;;  %vm95_vm9 = vcmp.eq.s32.totalorder %v2028_v7, 1  ;;  %vm92_vm12 = vcmp.eq.s32.totalorder %v2028_v7, 0 }
 0x131   :  { %3889 = vst [vmem:[#allocation50_spill] sm:$0xff] %v2008_v13  ;;  %vm53_vm2 = vcmp.ne.s32.totalorder %v38_v31, 0  ;;  %vm56_vm3 = vcmp.lt.s32.totalorder %v38_v31, 0  ;;  %vm54_vm4 = vcmp.ne.s32.totalorder %v49_v1, 0  ;;  %vm57_vm5 = vcmp.lt.s32.totalorder %v49_v1, 0 }
 0x132   :  { %v2010_v35 = vpop.permute.xlu0 %800  ;;  %vm59_vm7 = vmand %vm56_vm3, %vm53_vm2  ;;  %v62_v34 = vadd.s32 3, %v38_v31  ;;  %v63_v32 = vadd.s32 3, %v49_v1 }
 0x133   :  { %3890 = vst [vmem:[#allocation51_spill] sm:$0xff] %v2010_v35  ;;  %995 = vperm.xlu1 %1363, %v1833_v59   ;;  %vm60_vm8 = vmand %vm57_vm5, %vm54_vm4 }
 0x134   :  { %v2013_v38 = vpop.permute.xlu1 %667  ;;  %v2030_v36 = vsel %vm59_vm7, %v62_v34, %v38_v31  ;;  %v2032_v26 = vsel %vm60_vm8, %v63_v32, %v49_v1  ;;  %v329_v31 = vsel %vm95_vm9, %v1670_v41, %v1773_v11  ;;  %v335_v34 = vsel %vm95_vm9, %v1668_v40, %v1784_v17 }
 0x135   :  { %3891 = vst [vmem:[#allocation52_spill] sm:$0xff] %v2013_v38  ;;  %vm96_vm10 = vcmp.eq.s32.totalorder %v2030_v36, 1  ;;  %vm97_vm11 = vcmp.eq.s32.totalorder %v2032_v26, 1  ;;  %vm93_vm13 = vcmp.eq.s32.totalorder %v2030_v36, 0  ;;  %vm94_vm14 = vcmp.eq.s32.totalorder %v2032_v26, 0 }
 0x136   :  { %v2015_v60 = vpop.permute.xlu0 %808  ;;  %v330_v33 = vsel %vm96_vm10, %v1670_v41, %v1773_v11  ;;  %v331_v1 = vsel %vm97_vm11, %v1670_v41, %v1773_v11  ;;  %v336_v32 = vsel %vm96_vm10, %v1668_v40, %v1784_v17  ;;  %v337_v41 = vsel %vm97_vm11, %v1668_v40, %v1784_v17 }
 0x137   :  { %3892 = vst [vmem:[#allocation53_spill] sm:$0xff] %v2015_v60  ;;  %1003 = vperm.xlu1 %1363, %v1845_v39   ;;  %v338_v11 = vsel %vm95_vm9, %v1674_v42, %v1795_v23  ;;  %v2088_v40 = vsel %vm95_vm9, %v1680_v44, %v1806_v15  ;;  %v2094_v17 = vsel %vm96_vm10, %v1680_v44, %v1806_v15 }
 0x138   :  { %v2018_v63 = vpop.permute.xlu1 %677  ;;  %v2132_v38 = vsel %vm96_vm10, %v1692_v48, %v1828_v62  ;;  %v2250_v60 = vsel %vm97_vm11, %v1748_v0, %v1876_v10 }
 0x139   :  { %3893 = vst [vmem:[#allocation54_spill] sm:$0xff] %v2018_v63  ;;  %v2118_v63 = vsel %vm97_vm11, %v1686_v46, %v1817_v5  ;;  %3907 = vst [vmem:[#allocation68_spill] sm:$0xff] %v2250_v60 }
 0x13a   :  { %v2020_v2 = vpop.permute.xlu0 %816 }
 0x13b   :  { %3894 = vst [vmem:[#allocation55_spill] sm:$0xff] %v2020_v2  ;;  %v2226_v2 = vsel %vm96_vm10, %v1737_v61, %v1870_v8 }
 0x13c   :  { %v2022_v59 = vpop.permute.xlu1 %687 }
 0x13d   :  { %3895 = vst [vmem:[#allocation56_spill] sm:$0xff] %v2022_v59 }
 0x13e   :  { %v2024_v19 = vpop.permute.xlu0 %824 }
 0x13f   :  { %3896 = vst [vmem:[#allocation57_spill] sm:$0xff] %v2024_v19  ;;  %v2212_v19 = vsel %vm97_vm11, %v1726_v58, %v1864_v6 }
 0x140   :  { %v2026_v39 = vpop.permute.xlu1 %697 }
 0x141   :  { %3897 = vst [vmem:[#allocation58_spill] sm:$0xff] %v2026_v39  ;;  %v2100_v39 = vsel %vm97_vm11, %v1680_v44, %v1806_v15  ;;  %v2126_v15 = vsel %vm95_vm9, %v1692_v48, %v1828_v62 }
 0x142   :  { %v2034_v37 = vpop.permute.xlu0 %832 }
 0x143   :  { %3898 = vst [vmem:[#allocation59_spill] sm:$0xff] %v2034_v37  ;;  %v2194_v37 = vsel %vm97_vm11, %v1715_v55, %v1858_v47 }
 0x144   :  { %v2036_v9 = vpop.permute.xlu1 %707 }
 0x145   :  { %3899 = vst [vmem:[#allocation60_spill] sm:$0xff] %v2036_v9  ;;  %v340_v9 = vsel %vm97_vm11, %v1674_v42, %v1795_v23 }
 0x147   :  { %v2042_v59 = vpop.permute.xlu0 %415 }
 0x148   :  { %3900 = vst [vmem:[#allocation61_spill] sm:$0xff] %v2042_v59  ;;  %v2058_v21 = vpop.permute.xlu1 %717  ;;  %v2176_v59 = vsel %vm97_vm11, %v1704_v52, %v1851_v49 }
 0x149   :  { %3901 = vst [vmem:[#allocation62_spill] sm:$0xff] %v2058_v21  ;;  %v339_v21 = vsel %vm96_vm10, %v1674_v42, %v1795_v23  ;;  %v2106_v42 = vsel %vm95_vm9, %v1686_v46, %v1817_v5  ;;  %v2112_v23 = vsel %vm96_vm10, %v1686_v46, %v1817_v5  ;;  %v2138_v46 = vsel %vm97_vm11, %v1692_v48, %v1828_v62 }
 0x14a   :  { %v2144_v5 = vsel %vm95_vm9, %v1698_v50, %v1840_v53  ;;  %v2158_v48 = vsel %vm97_vm11, %v1698_v50, %v1840_v53  ;;  %v2164_v62 = vsel %vm95_vm9, %v1704_v52, %v1851_v49 }
 0x14b   :  { %v2120_v44 = vpop.permute.xlu0 %427 }
 0x14c   :  { %3902 = vst [vmem:[#allocation63_spill] sm:$0xff] %v2120_v44  ;;  %v2146_v13 = vpop.permute.xlu1 %727  ;;  %v2152_v44 = vsel %vm96_vm10, %v1698_v50, %v1840_v53  ;;  %v2182_v50 = vsel %vm95_vm9, %v1715_v55, %v1858_v47  ;;  %v2188_v53 = vsel %vm96_vm10, %v1715_v55, %v1858_v47  ;;  %v2218_v47 = vsel %vm95_vm9, %v1737_v61, %v1870_v8 }
 0x14d   :  { %3903 = vst [vmem:[#allocation64_spill] sm:$0xff] %v2146_v13  ;;  %v2170_v13 = vsel %vm96_vm10, %v1704_v52, %v1851_v49  ;;  %v2200_v49 = vsel %vm95_vm9, %v1726_v58, %v1864_v6  ;;  %v2206_v52 = vsel %vm96_vm10, %v1726_v58, %v1864_v6  ;;  %v2232_v58 = vsel %vm97_vm11, %v1737_v61, %v1870_v8 }
 0x14e   :  { %v2238_v6 = vsel %vm95_vm9, %v1748_v0, %v1876_v10  ;;  %v2256_v61 = vsel %vm95_vm9, %v1759_v3, %v1882_v12  ;;  %v2262_v8 = vsel %vm96_vm10, %v1759_v3, %v1882_v12  ;;  %v2298_v3 = vsel %vm94_vm14, %v1888_v14, %v331_v1  ;;  %v3914_v12 = vld [vmem:[#allocation5_spill] sm:$0xff] }
 0x14f   :  { %v2220_v55 = vpop.permute.xlu0 %435  ;;  %3905 = vst [vmem:[#allocation66_spill] sm:$0xff] %v2238_v6  ;;  %3908 = vst [vmem:[#allocation69_spill] sm:$0xff] %v2256_v61  ;;  %v2293_v61 = vsel %vm93_vm13, %v1888_v14, %v330_v33  ;;  %v3915_v33 = vld [vmem:[#allocation30_spill] sm:$0xff] }
 0x150   :  { %3904 = vst [vmem:[#allocation65_spill] sm:$0xff] %v2220_v55  ;;  %v2244_v55 = vsel %vm96_vm10, %v1748_v0, %v1876_v10  ;;  %3909 = vst [vmem:[#allocation70_spill] sm:$0xff] %v2262_v8  ;;  %v2271_v0 = vsel %vm95_vm9, %v1676_v43, %v1886_v51  ;;  %v2277_v10 = vsel %vm96_vm10, %v1676_v43, %v1886_v51 }
 0x151   :  { %3906 = vst [vmem:[#allocation67_spill] sm:$0xff] %v2244_v55  ;;  %v2264_v6 = vpop.permute.xlu1 %736  ;;  %v3910_v55 = vlaneseq  ;;  %v2283_v8 = vsel %vm97_vm11, %v1676_v43, %v1886_v51  ;;  %3912 = vst [vmem:[#allocation72_spill] sm:$0xff] %v2293_v61  ;;  %v2304_v43 = vsel %vm95_vm9, %v3914_v12, %v1892_v4  ;;  %v2310_v51 = vsel %vm96_vm10, %v3914_v12, %v1892_v4  ;;  %v3919_v61 = vld [vmem:[#allocation6_spill] sm:$0xff] }
 0x152   :  { %3913 = vst [vmem:[#allocation73_spill] sm:$0xff] %v2298_v3  ;;  %v2323_v1 = vsel %vm92_vm12, %v3915_v33, %v335_v34  ;;  %v2328_v60 = vsel %vm93_vm13, %v3915_v33, %v336_v32  ;;  %v2333_v3 = vsel %vm94_vm14, %v3915_v33, %v337_v41  ;;  %v2351_v34 = vsel %vm97_vm11, %v3919_v61, %v1898_v45  ;;  %v3921_v33 = vld [vmem:[#allocation31_spill] sm:$0xff] }
 0x153   :  { %v1088_v35 = vshrl.u32 %v3910_v55, 7  ;;  %v2288_v55 = vsel %vm92_vm12, %v1888_v14, %v329_v31  ;;  %v2312_v31 = vpop.permute.xlu0 %443  ;;  %v2318_v14 = vsel %vm97_vm11, %v3914_v12, %v1892_v4  ;;  %3916 = vst [vmem:[#allocation5_spill] sm:$0xff] %v2323_v1  ;;  %3917 = vst [vmem:[#allocation30_spill] sm:$0xff] %v2328_v60  ;;  %v2339_v4 = vsel %vm95_vm9, %v3919_v61, %v1898_v45  ;;  %v1085_v1 = vld [vmem:[%s3772_s2] sm:$0x7]  ;;  %s1391_s2 = smov [#allocation2]  }
 0x154   :  { %3911 = vst [vmem:[#allocation71_spill] sm:$0xff] %v2288_v55  ;;  %3918 = vst [vmem:[#allocation74_spill] sm:$0xff] %v2333_v3  ;;  %v2345_v12 = vsel %vm96_vm10, %v3919_v61, %v1898_v45  ;;  %v2358_v3 = vsel %vm92_vm12, %v3921_v33, %v338_v11  ;;  %v2363_v60 = vsel %vm93_vm13, %v3921_v33, %v339_v21  ;;  %s1332_s30 = sshll.u32 %s1391_s2, 4  ;;  %s1333_s30 = int_to_ptr.vmem [resolvable:$true] %s1332_s30 }
 0x155   :  { %v2353_v32 = vpop.permute.xlu1 %744  ;;  %v1089_v41 = vsub.s32 0, %v1088_v35  ;;  %3922 = vst [vmem:[#allocation31_spill] sm:$0xff] %v2358_v3  ;;  %3923 = vst [vmem:[#allocation75_spill] sm:$0xff] %v2363_v60  ;;  %v1093_v55 = vsub.s32 1, %v1088_v35  ;;  %v1097_v45 = vsub.s32 2, %v1088_v35  ;;  %v2371_v61 = vsel %vm94_vm14, %v3921_v33, %v340_v9  ;;  %v3926_v33 = vld [vmem:[#allocation32_spill] sm:$0xff]  ;;  %p1369_p1 = scmp.lt.s32.totalorder %s1333_s30, %s1333_s30 }
 0x156   :  { %3920 = vst [vmem:[#allocation6_spill] sm:$0xff] %v2353_v32  ;;  %3924 = vst [vmem:[#allocation76_spill] sm:$0xff] %v2371_v61  ;;  %v3925_v32 = vld [vmem:[#allocation7_spill] sm:$0xff]  ;;  %v2397_v61 = vsel %vm92_vm12, %v3926_v33, %v2088_v40  ;;  %v2403_v60 = vsel %vm93_vm13, %v3926_v33, %v2094_v17  ;;  %s1364_s4 = scalar_lea.vmem %s1333_s30, 9600 }
 0x157   :  { %v2377_v11 = vsel %vm95_vm9, %v3925_v32, %v1904_v56  ;;  %v2383_v21 = vsel %vm96_vm10, %v3925_v32, %v1904_v56  ;;  %v2389_v35 = vsel %vm97_vm11, %v3925_v32, %v1904_v56  ;;  %v2391_v9 = vpop.permute.xlu0 %451  ;;  %3927 = vst [vmem:[#allocation7_spill] sm:$0xff] %v2397_v61  ;;  %3928 = vst [vmem:[#allocation32_spill] sm:$0xff] %v2403_v60  ;;  %v3930_v32 = vld [vmem:[#allocation8_spill] sm:$0xff]  ;;  %p1365_p0 = scmp.ne.s32.totalorder %s1333_s30, %s1364_s4  ;;  %p1370_p2 = scmp.lt.s32.totalorder %s1364_s4, %s1364_s4 }
 0x158   :  { %v2409_v56 = vsel %vm94_vm14, %v3926_v33, %v2100_v39  ;;  %v2415_v3 = vsel %vm95_vm9, %v3930_v32, %v1910_v16  ;;  %v2421_v40 = vsel %vm96_vm10, %v3930_v32, %v1910_v16  ;;  %v2427_v17 = vsel %vm97_vm11, %v3930_v32, %v1910_v16  ;;  %v3931_v39 = vld [vmem:[#allocation33_spill] sm:$0xff] }
 0x159   :  { %3929 = vst [vmem:[#allocation77_spill] sm:$0xff] %v2409_v56  ;;  %v2433_v33 = vsel %vm92_vm12, %v3931_v39, %v2106_v42  ;;  %v2435_v56 = vpop.permute.xlu1 %748  ;;  %v2437_v60 = vrot.slane %v1085_v1, %v1089_v41  ;;  %v2443_v61 = vsel %vm93_vm13, %v3931_v39, %v2112_v23  ;;  %v2449_v16 = vsel %vm94_vm14, %v3931_v39, %v2118_v63  ;;  %p1371_p3 = por %p1370_p2, %p1369_p1 }
 0x15a   :  { %3932 = vst [vmem:[#allocation8_spill] sm:$0xff] %v2433_v33  ;;  %3933 = vst [vmem:[#allocation33_spill] sm:$0xff] %v2443_v61  ;;  %v2451_v32 = vrot.slane %v1085_v1, %v1093_v55  ;;  %v2453_v42 = vrot.slane %v1085_v1, %v1097_v45  ;;  %v3935_v33 = vld [vmem:[#allocation9_spill] sm:$0xff]  ;;  %v3936_v55 = vld [vmem:[#allocation34_spill] sm:$0xff] }
 0x15b   :  { %3934 = vst [vmem:[#allocation78_spill] sm:$0xff] %v2449_v16  ;;  %v2459_v41 = vsel %vm95_vm9, %v3935_v33, %v1916_v18  ;;  %v2465_v23 = vsel %vm96_vm10, %v3935_v33, %v1916_v18  ;;  %v2471_v63 = vsel %vm97_vm11, %v3935_v33, %v1916_v18  ;;  %v2477_v1 = vsel %vm92_vm12, %v3936_v55, %v2126_v15  ;;  %v2479_v45 = vpop.permute.xlu0 %459  ;;  %v3940_v33 = vld [vmem:[#allocation10_spill] sm:$0xff]  ;;  %p1372_p4 = pnand %p1371_p3, %p1365_p0 }
 0x15c   :  { %3937 = vst [vmem:[#allocation9_spill] sm:$0xff] %v2477_v1  ;;  %v2485_v39 = vsel %vm93_vm13, %v3936_v55, %v2132_v38  ;;  %v2491_v18 = vsel %vm94_vm14, %v3936_v55, %v2138_v46  ;;  %v2497_v15 = vsel %vm95_vm9, %v3940_v33, %v1922_v20  ;;  %v2503_v1 = vsel %vm96_vm10, %v3940_v33, %v1922_v20  ;;  %v3941_v46 = vld [vmem:[#allocation35_spill] sm:$0xff] }
 0x15d   :  { %3938 = vst [vmem:[#allocation34_spill] sm:$0xff] %v2485_v39  ;;  %3939 = vst [vmem:[#allocation79_spill] sm:$0xff] %v2491_v18  ;;  %v2509_v38 = vsel %vm97_vm11, %v3940_v33, %v1922_v20  ;;  %v2515_v55 = vsel %vm92_vm12, %v3941_v46, %v2144_v5  ;;  %v2521_v18 = vsel %vm93_vm13, %v3941_v46, %v2152_v44  ;;  %v2529_v20 = vpop.permute.xlu1 %756  ;;  %v3945_v33 = vld [vmem:[#allocation11_spill] sm:$0xff] }
 0x15e   :  { %3942 = vst [vmem:[#allocation10_spill] sm:$0xff] %v2515_v55  ;;  %3943 = vst [vmem:[#allocation35_spill] sm:$0xff] %v2521_v18  ;;  %v2527_v39 = vsel %vm94_vm14, %v3941_v46, %v2158_v48  ;;  %v2535_v5 = vsel %vm95_vm9, %v3945_v33, %v1928_v22  ;;  %v2541_v44 = vsel %vm96_vm10, %v3945_v33, %v1928_v22  ;;  %v3946_v46 = vld [vmem:[#allocation36_spill] sm:$0xff] }
 0x15f   :  { %3944 = vst [vmem:[#allocation80_spill] sm:$0xff] %v2527_v39  ;;  %v2547_v48 = vsel %vm97_vm11, %v3945_v33, %v1928_v22  ;;  %v2553_v39 = vsel %vm92_vm12, %v3946_v46, %v2164_v62  ;;  %v2559_v18 = vsel %vm93_vm13, %v3946_v46, %v2170_v13  ;;  %v2565_v55 = vsel %vm94_vm14, %v3946_v46, %v2176_v59  ;;  %v3950_v22 = vld [vmem:[#allocation12_spill] sm:$0xff]  ;;  %v2579_v13 = vpop.permute.xlu0 %467 }
 0x160   :  { %3947 = vst [vmem:[#allocation11_spill] sm:$0xff] %v2553_v39  ;;  %3948 = vst [vmem:[#allocation36_spill] sm:$0xff] %v2559_v18  ;;  %v2571_v33 = vsel %vm95_vm9, %v3950_v22, %v1934_v24  ;;  %v2577_v62 = vsel %vm96_vm10, %v3950_v22, %v1934_v24  ;;  %v2585_v59 = vsel %vm97_vm11, %v3950_v22, %v1934_v24  ;;  %v3954_v24 = vld [vmem:[#allocation13_spill] sm:$0xff]  ;;  %v3972_v39 = vld [vmem:[#allocation19_spill] sm:$0xff] }
 0x161   :  { %3949 = vst [vmem:[#allocation81_spill] sm:$0xff] %v2565_v55  ;;  %v2591_v46 = vsel %vm92_vm12, %v1937_v28, %v2182_v50  ;;  %v2597_v55 = vsel %vm93_vm13, %v1937_v28, %v2188_v53  ;;  %v2603_v18 = vsel %vm94_vm14, %v1937_v28, %v2194_v37  ;;  %v2609_v22 = vsel %vm95_vm9, %v3954_v24, %v1940_v25  ;;  %v2629_v37 = vpop.permute.xlu1 %764 }
 0x162   :  { %3951 = vst [vmem:[#allocation12_spill] sm:$0xff] %v2591_v46  ;;  %3952 = vst [vmem:[#allocation82_spill] sm:$0xff] %v2597_v55  ;;  %v2615_v50 = vsel %vm96_vm10, %v3954_v24, %v1940_v25  ;;  %v2621_v53 = vsel %vm97_vm11, %v3954_v24, %v1940_v25  ;;  %v2627_v28 = vsel %vm92_vm12, %v1943_v29, %v2200_v49  ;;  %v3958_v24 = vld [vmem:[#allocation15_spill] sm:$0xff] }
 0x163   :  { %3953 = vst [vmem:[#allocation83_spill] sm:$0xff] %v2603_v18  ;;  %3955 = vst [vmem:[#allocation13_spill] sm:$0xff] %v2627_v28  ;;  %v2635_v18 = vsel %vm93_vm13, %v1943_v29, %v2206_v52  ;;  %v2641_v25 = vsel %vm94_vm14, %v1943_v29, %v2212_v19  ;;  %v2647_v49 = vsel %vm95_vm9, %v3958_v24, %v1946_v27 }
 0x164   :  { %3956 = vst [vmem:[#allocation84_spill] sm:$0xff] %v2635_v18  ;;  %3957 = vst [vmem:[#allocation85_spill] sm:$0xff] %v2641_v25  ;;  %v2653_v28 = vsel %vm96_vm10, %v3958_v24, %v1946_v27  ;;  %v2659_v52 = vsel %vm97_vm11, %v3958_v24, %v1946_v27  ;;  %v2665_v29 = vsel %vm92_vm12, %v1949_v30, %v2218_v47  ;;  %v2679_v27 = vpop.permute.xlu0 %475  ;;  %v3964_v24 = vld [vmem:[#allocation16_spill] sm:$0xff] }
 0x165   :  { %3959 = vst [vmem:[#allocation15_spill] sm:$0xff] %v2653_v28  ;;  %3960 = vst [vmem:[#allocation86_spill] sm:$0xff] %v2659_v52  ;;  %v2671_v19 = vsel %vm93_vm13, %v1949_v30, %v2226_v2  ;;  %v2677_v25 = vsel %vm94_vm14, %v1949_v30, %v2232_v58  ;;  %v2685_v47 = vsel %vm95_vm9, %v3964_v24, %v1952_v54  ;;  %v3968_v58 = vld [vmem:[#allocation17_spill] sm:$0xff]  ;;  %v2729_v46 = vpop.permute.xlu1 %772 }
 0x166   :  { %3961 = vst [vmem:[#allocation87_spill] sm:$0xff] %v2665_v29  ;;  %3962 = vst [vmem:[#allocation88_spill] sm:$0xff] %v2671_v19  ;;  %v2691_v2 = vsel %vm96_vm10, %v3964_v24, %v1952_v54  ;;  %v2697_v30 = vsel %vm97_vm11, %v3964_v24, %v1952_v54  ;;  %v2709_v19 = vsel %vm96_vm10, %v3968_v58, %v1958_v57  ;;  %v3969_v54 = vld [vmem:[#allocation39_spill] sm:$0xff]  ;;  %v3970_v24 = vld [vmem:[#allocation18_spill] sm:$0xff] }
 0x167   :  { %3963 = vst [vmem:[#allocation89_spill] sm:$0xff] %v2677_v25  ;;  %3965 = vst [vmem:[#allocation16_spill] sm:$0xff] %v2685_v47  ;;  %v2703_v25 = vsel %vm95_vm9, %v3968_v58, %v1958_v57  ;;  %v2715_v29 = vsel %vm97_vm11, %v3968_v58, %v1958_v57  ;;  %v2721_v18 = vsel %vm95_vm9, %v3970_v24, %v3969_v54  ;;  %v3971_v58 = vld [vmem:[#allocation41_spill] sm:$0xff] }
 0x168   :  { %3966 = vst [vmem:[#allocation90_spill] sm:$0xff] %v2691_v2  ;;  %3967 = vst [vmem:[#allocation91_spill] sm:$0xff] %v2697_v30  ;;  %v2727_v55 = vsel %vm96_vm10, %v3970_v24, %v3969_v54  ;;  %v2735_v57 = vsel %vm97_vm11, %v3970_v24, %v3969_v54  ;;  %v2741_v16 = vsel %vm95_vm9, %v3972_v39, %v3971_v58  ;;  %v3976_v54 = vld [vmem:[#allocation43_spill] sm:$0xff]  ;;  %v3977_v24 = vld [vmem:[#allocation20_spill] sm:$0xff] }
 0x169   :  { %3973 = vst [vmem:[#allocation17_spill] sm:$0xff] %v2741_v16  ;;  %v2747_v61 = vsel %vm96_vm10, %v3972_v39, %v3971_v58  ;;  %v2753_v30 = vsel %vm97_vm11, %v3972_v39, %v3971_v58  ;;  %v2759_v2 = vsel %vm95_vm9, %v3977_v24, %v3976_v54  ;;  %v2765_v47 = vsel %vm96_vm10, %v3977_v24, %v3976_v54  ;;  %v3981_v39 = vld [vmem:[#allocation45_spill] sm:$0xff] }
 0x16a   :  { %3974 = vst [vmem:[#allocation39_spill] sm:$0xff] %v2747_v61  ;;  %3975 = vst [vmem:[#allocation18_spill] sm:$0xff] %v2753_v30  ;;  %v2771_v52 = vsel %vm97_vm11, %v3977_v24, %v3976_v54  ;;  %v3982_v58 = vld [vmem:[#allocation21_spill] sm:$0xff]  ;;  %v2779_v61 = vpop.permute.xlu0 %483  ;;  %v3986_v24 = vld [vmem:[#allocation47_spill] sm:$0xff] }
 0x16b   :  { %3978 = vst [vmem:[#allocation41_spill] sm:$0xff] %v2759_v2  ;;  %3979 = vst [vmem:[#allocation19_spill] sm:$0xff] %v2765_v47  ;;  %v2777_v30 = vsel %vm95_vm9, %v3982_v58, %v3981_v39  ;;  %v2785_v2 = vsel %vm96_vm10, %v3982_v58, %v3981_v39  ;;  %v2791_v54 = vsel %vm97_vm11, %v3982_v58, %v3981_v39  ;;  %v3991_v39 = vld [vmem:[#allocation49_spill] sm:$0xff]  ;;  %v3992_v58 = vld [vmem:[#allocation23_spill] sm:$0xff] }
 0x16c   :  { %3980 = vst [vmem:[#allocation43_spill] sm:$0xff] %v2771_v52  ;;  %3983 = vst [vmem:[#allocation20_spill] sm:$0xff] %v2777_v30  ;;  %v3987_v52 = vld [vmem:[#allocation22_spill] sm:$0xff] }
 0x16d   :  { %3984 = vst [vmem:[#allocation45_spill] sm:$0xff] %v2785_v2  ;;  %3985 = vst [vmem:[#allocation21_spill] sm:$0xff] %v2791_v54  ;;  %v2797_v47 = vsel %vm95_vm9, %v3987_v52, %v3986_v24  ;;  %v2803_v30 = vsel %vm96_vm10, %v3987_v52, %v3986_v24  ;;  %v2809_v2 = vsel %vm97_vm11, %v3987_v52, %v3986_v24  ;;  %v2829_v52 = vpop.permute.xlu1 %780  ;;  %v3996_v24 = vld [vmem:[#allocation51_spill] sm:$0xff] }
 0x16e   :  { %3988 = vst [vmem:[#allocation47_spill] sm:$0xff] %v2797_v47  ;;  %3989 = vst [vmem:[#allocation22_spill] sm:$0xff] %v2803_v30  ;;  %v2815_v54 = vsel %vm95_vm9, %v3992_v58, %v3991_v39  ;;  %v2821_v47 = vsel %vm96_vm10, %v3992_v58, %v3991_v39  ;;  %v2827_v30 = vsel %vm97_vm11, %v3992_v58, %v3991_v39  ;;  %v4001_v58 = vld [vmem:[#allocation53_spill] sm:$0xff]  ;;  %v2879_v28 = vpop.permute.xlu0 %491 }
 0x16f   :  { %3990 = vst [vmem:[#allocation92_spill] sm:$0xff] %v2809_v2  ;;  %3993 = vst [vmem:[#allocation49_spill] sm:$0xff] %v2815_v54  ;;  %v3997_v2 = vld [vmem:[#allocation24_spill] sm:$0xff] }
 0x170   :  { %3994 = vst [vmem:[#allocation23_spill] sm:$0xff] %v2821_v47  ;;  %3995 = vst [vmem:[#allocation93_spill] sm:$0xff] %v2827_v30  ;;  %v2835_v16 = vsel %vm95_vm9, %v3997_v2, %v3996_v24  ;;  %v2841_v54 = vsel %vm96_vm10, %v3997_v2, %v3996_v24  ;;  %v2847_v39 = vsel %vm97_vm11, %v3997_v2, %v3996_v24  ;;  %v4002_v30 = vld [vmem:[#allocation25_spill] sm:$0xff]  ;;  %v4006_v2 = vld [vmem:[#allocation55_spill] sm:$0xff] }
 0x171   :  { %3998 = vst [vmem:[#allocation51_spill] sm:$0xff] %v2835_v16  ;;  %3999 = vst [vmem:[#allocation24_spill] sm:$0xff] %v2841_v54  ;;  %v2853_v47 = vsel %vm95_vm9, %v4002_v30, %v4001_v58  ;;  %v2859_v16 = vsel %vm96_vm10, %v4002_v30, %v4001_v58  ;;  %v2865_v54 = vsel %vm97_vm11, %v4002_v30, %v4001_v58  ;;  %v4007_v24 = vld [vmem:[#allocation26_spill] sm:$0xff]  ;;  %v4011_v58 = vld [vmem:[#allocation57_spill] sm:$0xff] }
 0x172   :  { %4000 = vst [vmem:[#allocation94_spill] sm:$0xff] %v2847_v39  ;;  %4003 = vst [vmem:[#allocation53_spill] sm:$0xff] %v2853_v47  ;;  %v2871_v39 = vsel %vm95_vm9, %v4007_v24, %v4006_v2  ;;  %v2877_v47 = vsel %vm96_vm10, %v4007_v24, %v4006_v2  ;;  %v2885_v30 = vsel %vm97_vm11, %v4007_v24, %v4006_v2  ;;  %v4016_v2 = vld [vmem:[#allocation59_spill] sm:$0xff]  ;;  %v4017_v24 = vld [vmem:[#allocation28_spill] sm:$0xff] }
 0x173   :  { %4004 = vst [vmem:[#allocation25_spill] sm:$0xff] %v2859_v16  ;;  %4005 = vst [vmem:[#allocation95_spill] sm:$0xff] %v2865_v54  ;;  %v4012_v54 = vld [vmem:[#allocation27_spill] sm:$0xff] }
 0x174   :  { %4008 = vst [vmem:[#allocation55_spill] sm:$0xff] %v2871_v39  ;;  %4009 = vst [vmem:[#allocation26_spill] sm:$0xff] %v2877_v47  ;;  %v2891_v16 = vsel %vm95_vm9, %v4012_v54, %v4011_v58  ;;  %v2897_v39 = vsel %vm96_vm10, %v4012_v54, %v4011_v58  ;;  %v2903_v47 = vsel %vm97_vm11, %v4012_v54, %v4011_v58  ;;  %v4021_v54 = vld [vmem:[#allocation61_spill] sm:$0xff] }
 0x175   :  { %4010 = vst [vmem:[#allocation96_spill] sm:$0xff] %v2885_v30  ;;  %4013 = vst [vmem:[#allocation57_spill] sm:$0xff] %v2891_v16  ;;  %v2909_v30 = vsel %vm95_vm9, %v4017_v24, %v4016_v2  ;;  %v2915_v16 = vsel %vm96_vm10, %v4017_v24, %v4016_v2  ;;  %v513_v58 = vsel %vm92_vm12, %v4021_v54, %v2271_v0 }
 0x176   :  { %4014 = vst [vmem:[#allocation27_spill] sm:$0xff] %v2897_v39  ;;  %4015 = vst [vmem:[#allocation97_spill] sm:$0xff] %v2903_v47  ;;  %v2921_v39 = vsel %vm97_vm11, %v4017_v24, %v4016_v2  ;;  %v2927_v47 = vpop.permute.xlu1 %788  ;;  %v4022_v2 = vld [vmem:[#allocation63_spill] sm:$0xff] }
 0x177   :  { %4018 = vst [vmem:[#allocation59_spill] sm:$0xff] %v2909_v30  ;;  %4019 = vst [vmem:[#allocation28_spill] sm:$0xff] %v2915_v16  ;;  %v514_v30 = vsel %vm93_vm13, %v4021_v54, %v2277_v10  ;;  %v515_v16 = vsel %vm94_vm14, %v4021_v54, %v2283_v8  ;;  %v2941_v24 = vsel %vm92_vm12, %v4022_v2, %v2304_v43  ;;  %v4023_v8 = vld [vmem:[#allocation65_spill] sm:$0xff] }
 0x178   :  { %4020 = vst [vmem:[#allocation98_spill] sm:$0xff] %v2921_v39  ;;  %v2947_v0 = vsel %vm93_vm13, %v4022_v2, %v2310_v51  ;;  %v2953_v10 = vsel %vm94_vm14, %v4022_v2, %v2318_v14  ;;  %v2959_v54 = vsel %vm92_vm12, %v4023_v8, %v2339_v4  ;;  %v2965_v43 = vsel %vm93_vm13, %v4023_v8, %v2345_v12  ;;  %v2973_v14 = vpop.permute.xlu0 %499  ;;  %v4024_v2 = vld [vmem:[#allocation40_spill] sm:$0xff] }
 0x179   :  { %v2971_v51 = vsel %vm94_vm14, %v4023_v8, %v2351_v34  ;;  %v2979_v4 = vsel %vm95_vm9, %v4024_v2, %v2264_v6  ;;  %v2985_v12 = vsel %vm96_vm10, %v4024_v2, %v2264_v6  ;;  %v2991_v34 = vsel %vm97_vm11, %v4024_v2, %v2264_v6  ;;  %v4027_v6 = vld [vmem:[#allocation6_spill] sm:$0xff] }
 0x17a   :  { %4025 = vst [vmem:[#allocation61_spill] sm:$0xff] %v2985_v12  ;;  %4026 = vst [vmem:[#allocation63_spill] sm:$0xff] %v2991_v34  ;;  %v2997_v8 = vsel %vm92_vm12, %v2312_v31, %v2377_v11  ;;  %v3003_v39 = vsel %vm93_vm13, %v2312_v31, %v2383_v21  ;;  %v3009_v12 = vsel %vm94_vm14, %v2312_v31, %v2389_v35  ;;  %v4028_v2 = vld [vmem:[#allocation42_spill] sm:$0xff]  ;;  %v3023_v21 = vpop.permute.xlu1 %796 }
 0x17b   :  { %v3015_v34 = vsel %vm95_vm9, %v4028_v2, %v4027_v6  ;;  %v3021_v11 = vsel %vm96_vm10, %v4028_v2, %v4027_v6  ;;  %v3029_v31 = vsel %vm97_vm11, %v4028_v2, %v4027_v6  ;;  %v3035_v35 = vsel %vm92_vm12, %v2391_v9, %v2415_v3  ;;  %v4031_v6 = vld [vmem:[#allocation44_spill] sm:$0xff] }
 0x17c   :  { %4029 = vst [vmem:[#allocation65_spill] sm:$0xff] %v3015_v34  ;;  %4030 = vst [vmem:[#allocation40_spill] sm:$0xff] %v3021_v11  ;;  %v3041_v34 = vsel %vm93_vm13, %v2391_v9, %v2421_v40  ;;  %v3047_v11 = vsel %vm94_vm14, %v2391_v9, %v2427_v17  ;;  %v3053_v2 = vsel %vm95_vm9, %v4031_v6, %v2435_v56  ;;  %v3073_v17 = vpop.permute.xlu0 %507 }
 0x17d   :  { %4032 = vst [vmem:[#allocation6_spill] sm:$0xff] %v3053_v2  ;;  %v3059_v3 = vsel %vm96_vm10, %v4031_v6, %v2435_v56  ;;  %v3065_v40 = vsel %vm97_vm11, %v4031_v6, %v2435_v56  ;;  %v3071_v9 = vsel %vm92_vm12, %v2479_v45, %v2459_v41  ;;  %v3079_v2 = vsel %vm93_vm13, %v2479_v45, %v2465_v23  ;;  %v4034_v6 = vld [vmem:[#allocation46_spill] sm:$0xff] }
 0x17e   :  { %4033 = vst [vmem:[#allocation42_spill] sm:$0xff] %v3065_v40  ;;  %v3085_v56 = vsel %vm94_vm14, %v2479_v45, %v2471_v63  ;;  %v3091_v41 = vsel %vm95_vm9, %v4034_v6, %v2529_v20  ;;  %v3097_v40 = vsel %vm96_vm10, %v4034_v6, %v2529_v20  ;;  %v3103_v23 = vsel %vm97_vm11, %v4034_v6, %v2529_v20  ;;  %v3123_v20 = vpop.permute.xlu1 %804  ;;  %v4036_v6 = vld [vmem:[#allocation48_spill] sm:$0xff] }
 0x17f   :  { %4035 = vst [vmem:[#allocation44_spill] sm:$0xff] %v3097_v40  ;;  %v3109_v63 = vsel %vm92_vm12, %v2579_v13, %v2497_v15  ;;  %v3115_v45 = vsel %vm93_vm13, %v2579_v13, %v2503_v1  ;;  %v3121_v40 = vsel %vm94_vm14, %v2579_v13, %v2509_v38  ;;  %v3129_v15 = vsel %vm95_vm9, %v4036_v6, %v2629_v37 }
 0x180   :  { %4037 = vst [vmem:[#allocation46_spill] sm:$0xff] %v3129_v15  ;;  %v3135_v1 = vsel %vm96_vm10, %v4036_v6, %v2629_v37  ;;  %v3141_v38 = vsel %vm97_vm11, %v4036_v6, %v2629_v37  ;;  %v3147_v13 = vsel %vm92_vm12, %v2679_v27, %v2535_v5  ;;  %v3153_v15 = vsel %vm93_vm13, %v2679_v27, %v2541_v44  ;;  %v4040_v37 = vld [vmem:[#allocation50_spill] sm:$0xff]  ;;  %v916_v44 = vpop.permute.xlu0 %915 }
 0x181   :  { %4038 = vst [vmem:[#allocation48_spill] sm:$0xff] %v3135_v1  ;;  %4039 = vst [vmem:[#allocation99_spill] sm:$0xff] %v3153_v15  ;;  %v3159_v1 = vsel %vm94_vm14, %v2679_v27, %v2547_v48  ;;  %v3165_v6 = vsel %vm95_vm9, %v4040_v37, %v2729_v46  ;;  %v3171_v5 = vsel %vm96_vm10, %v4040_v37, %v2729_v46 }
 0x182   :  { %4041 = vst [vmem:[#allocation50_spill] sm:$0xff] %v3165_v6  ;;  %4042 = vst [vmem:[#allocation100_spill] sm:$0xff] %v3171_v5  ;;  %v3177_v15 = vsel %vm97_vm11, %v4040_v37, %v2729_v46  ;;  %v1013_v48 = vsel %vm92_vm12, %v916_v44, %v2703_v25  ;;  %v1014_v27 = vsel %vm93_vm13, %v916_v44, %v2709_v19 }
 0x183   :  { %4043 = vst [vmem:[#allocation101_spill] sm:$0xff] %v3177_v15  ;;  %v1015_v6 = vsel %vm94_vm14, %v916_v44, %v2715_v29  ;;  %v3192_v5 = vsel %vm92_vm12, %v2779_v61, %v2571_v33  ;;  %v1105_v46 = vmul.f32 %v2437_v60, %v1013_v48  ;;  %v1106_v37 = vmul.f32 %v2451_v32, %v1014_v27  ;;  %v3197_v15 = vpop.permute.xlu1 %812  ;;  %v4045_v29 = vld [vmem:[#allocation52_spill] sm:$0xff] }
 0x184   :  { %v1107_v25 = vmul.f32 %v2453_v42, %v1015_v6  ;;  %v3203_v19 = vsel %vm93_vm13, %v2779_v61, %v2577_v62  ;;  %v3209_v33 = vsel %vm94_vm14, %v2779_v61, %v2585_v59  ;;  %v3215_v44 = vsel %vm95_vm9, %v4045_v29, %v2829_v52  ;;  %v928_v27 = vpop.permute.xlu0 %927 }
 0x185   :  { %4044 = vst [vmem:[#allocation102_spill] sm:$0xff] %v3209_v33  ;;  %4046 = vst [vmem:[#allocation52_spill] sm:$0xff] %v3215_v44  ;;  %v3221_v6 = vsel %vm96_vm10, %v4045_v29, %v2829_v52  ;;  %v3227_v62 = vsel %vm97_vm11, %v4045_v29, %v2829_v52  ;;  %v1180_v61 = vadd.f32 %v1105_v46, %v513_v58 }
 0x186   :  { %4047 = vst [vmem:[#allocation103_spill] sm:$0xff] %v3221_v6  ;;  %v1181_v59 = vadd.f32 %v1106_v37, %v514_v30  ;;  %v1182_v48 = vadd.f32 %v1107_v25, %v515_v16  ;;  %v3233_v44 = vsel %vm92_vm12, %v2879_v28, %v2609_v22  ;;  %v1022_v6 = vsel %vm92_vm12, %v928_v27, %v2721_v18 }
 0x187   :  { %v1023_v33 = vsel %vm93_vm13, %v928_v27, %v2727_v55  ;;  %v1024_v52 = vsel %vm94_vm14, %v928_v27, %v2735_v57  ;;  %v3248_v16 = vsel %vm93_vm13, %v2879_v28, %v2615_v50  ;;  %1255 = vst [vmem:[#allocation2 + $0x18] sm:$0xff] %v1180_v61  ;;  %v1114_v22 = vmul.f32 %v2437_v60, %v1022_v6  ;;  %v3253_v55 = vpop.permute.xlu1 %820  ;;  %v4049_v50 = vld [vmem:[#allocation54_spill] sm:$0xff]  ;;  %v4050_v6 = vld [vmem:[#allocation15_spill] sm:$0xff] }
 0x188   :  { %1256 = vst [vmem:[#allocation2 + $0x20] sm:$0xff] %v1181_v59  ;;  %1257 = vst [vmem:[#allocation2 + $0x28] sm:$0xff] %v1182_v48  ;;  %v1115_v18 = vmul.f32 %v2451_v32, %v1023_v33  ;;  %v1116_v30 = vmul.f32 %v2453_v42, %v1024_v52  ;;  %v3259_v57 = vsel %vm94_vm14, %v2879_v28, %v2621_v53  ;;  %v936_v29 = vpop.permute.xlu0 %935  ;;  %v4052_v48 = vld [vmem:[#allocation39_spill] sm:$0xff] }
 0x189   :  { %4048 = vst [vmem:[#allocation104_spill] sm:$0xff] %v3253_v55  ;;  %v3265_v58 = vsel %vm95_vm9, %v4049_v50, %v2927_v47  ;;  %v3271_v46 = vsel %vm96_vm10, %v4049_v50, %v2927_v47  ;;  %v3277_v37 = vsel %vm97_vm11, %v4049_v50, %v2927_v47  ;;  %v3283_v53 = vsel %vm92_vm12, %v2973_v14, %v2647_v49  ;;  %v4051_v47 = vld [vmem:[#allocation17_spill] sm:$0xff]  ;;  %v4056_v50 = vld [vmem:[#allocation56_spill] sm:$0xff] }
 0x18a   :  { %v1189_v28 = vadd.f32 %v1114_v22, %v2941_v24  ;;  %v1190_v25 = vadd.f32 %v1115_v18, %v2947_v0  ;;  %v1191_v33 = vadd.f32 %v1116_v30, %v2953_v10  ;;  %v3292_v61 = vsel %vm93_vm13, %v2973_v14, %v4050_v6  ;;  %v4053_v24 = vld [vmem:[#allocation18_spill] sm:$0xff] }
 0x18b   :  { %v1028_v59 = vsel %vm92_vm12, %v936_v29, %v4051_v47  ;;  %v1029_v49 = vsel %vm93_vm13, %v936_v29, %v4052_v48  ;;  %v1030_v0 = vsel %vm94_vm14, %v936_v29, %v4053_v24  ;;  %v4054_v10 = vld [vmem:[#allocation86_spill] sm:$0xff]  ;;  %v3312_v30 = vpop.permute.xlu1 %828  ;;  %v3318_v29 = vsel %vm95_vm9, %v4056_v50, %v3023_v21  ;;  %v4059_v24 = vld [vmem:[#allocation91_spill] sm:$0xff] }
 0x18c   :  { %v3307_v27 = vsel %vm94_vm14, %v2973_v14, %v4054_v10  ;;  %1264 = vst [vmem:[#allocation2 + $0x60] sm:$0xff] %v1189_v28  ;;  %1265 = vst [vmem:[#allocation2 + $0x68] sm:$0xff] %v1190_v25  ;;  %v1120_v52 = vmul.f32 %v2437_v60, %v1028_v59  ;;  %v1121_v22 = vmul.f32 %v2451_v32, %v1029_v49  ;;  %v4057_v25 = vld [vmem:[#allocation16_spill] sm:$0xff]  ;;  %v4058_v6 = vld [vmem:[#allocation90_spill] sm:$0xff] }
 0x18d   :  { %1266 = vst [vmem:[#allocation2 + $0x70] sm:$0xff] %v1191_v33  ;;  %v1122_v18 = vmul.f32 %v2453_v42, %v1030_v0  ;;  %4055 = vst [vmem:[#allocation54_spill] sm:$0xff] %v3312_v30  ;;  %v3324_v14 = vsel %vm96_vm10, %v4056_v50, %v3023_v21  ;;  %v3330_v28 = vsel %vm97_vm11, %v4056_v50, %v3023_v21  ;;  %v944_v21 = vpop.permute.xlu0 %943  ;;  %v4060_v10 = vld [vmem:[#allocation41_spill] sm:$0xff]  ;;  %v4070_v30 = vld [vmem:[#allocation63_spill] sm:$0xff] }
 0x18e   :  { %v3336_v33 = vsel %vm92_vm12, %v3073_v17, %v4057_v25  ;;  %v3342_v47 = vsel %vm93_vm13, %v3073_v17, %v4058_v6  ;;  %v1195_v59 = vadd.f32 %v1120_v52, %v2959_v54  ;;  %v1196_v48 = vadd.f32 %v1121_v22, %v2965_v43  ;;  %v4061_v25 = vld [vmem:[#allocation19_spill] sm:$0xff] }
 0x18f   :  { %v1197_v49 = vadd.f32 %v1122_v18, %v2971_v51  ;;  %v3351_v0 = vsel %vm94_vm14, %v3073_v17, %v4059_v24  ;;  %v1034_v50 = vsel %vm92_vm12, %v944_v21, %v4060_v10  ;;  %v1035_v6 = vsel %vm93_vm13, %v944_v21, %v4061_v25  ;;  %v4062_v54 = vld [vmem:[#allocation43_spill] sm:$0xff]  ;;  %v4063_v51 = vld [vmem:[#allocation58_spill] sm:$0xff]  ;;  %v912_v10 = vpop.permute.xlu1 %911 }
 0x190   :  { %v1036_v43 = vsel %vm94_vm14, %v944_v21, %v4062_v54  ;;  %v3366_v52 = vsel %vm95_vm9, %v4063_v51, %v3123_v20  ;;  %1270 = vst [vmem:[#allocation2 + $0x90] sm:$0xff] %v1195_v59  ;;  %1271 = vst [vmem:[#allocation2 + $0x98] sm:$0xff] %v1196_v48  ;;  %v1126_v17 = vmul.f32 %v2437_v60, %v1034_v50  ;;  %v4066_v59 = vld [vmem:[#allocation60_spill] sm:$0xff] }
 0x191   :  { %1272 = vst [vmem:[#allocation2 + $0xa0] sm:$0xff] %v1197_v49  ;;  %v1127_v22 = vmul.f32 %v2451_v32, %v1035_v6  ;;  %v1128_v18 = vmul.f32 %v2453_v42, %v1036_v43  ;;  %v3375_v21 = vsel %vm96_vm10, %v4063_v51, %v3123_v20  ;;  %v3381_v24 = vsel %vm97_vm11, %v4063_v51, %v3123_v20  ;;  %v952_v54 = vpop.permute.xlu0 %951  ;;  %v4069_v43 = vld [vmem:[#allocation61_spill] sm:$0xff] }
 0x192   :  { %4064 = vst [vmem:[#allocation15_spill] sm:$0xff] %v3375_v21  ;;  %4065 = vst [vmem:[#allocation17_spill] sm:$0xff] %v3381_v24  ;;  %v3387_v48 = vsel %vm95_vm9, %v4066_v59, %v3197_v15  ;;  %v3393_v49 = vsel %vm96_vm10, %v4066_v59, %v3197_v15  ;;  %v1201_v50 = vadd.f32 %v1126_v17, %v2997_v8  ;;  %v4071_v8 = vld [vmem:[#allocation20_spill] sm:$0xff]  ;;  %v4072_v17 = vld [vmem:[#allocation45_spill] sm:$0xff] }
 0x193   :  { %4067 = vst [vmem:[#allocation39_spill] sm:$0xff] %v3387_v48  ;;  %4068 = vst [vmem:[#allocation18_spill] sm:$0xff] %v3393_v49  ;;  %v1202_v25 = vadd.f32 %v1127_v22, %v3003_v39  ;;  %v1203_v20 = vadd.f32 %v1128_v18, %v3009_v12  ;;  %v1010_v6 = vsel %vm92_vm12, %v912_v10, %v2979_v4  ;;  %v4073_v18 = vld [vmem:[#allocation21_spill] sm:$0xff]  ;;  %v4078_v21 = vld [vmem:[#allocation40_spill] sm:$0xff] }
 0x194   :  { %v1011_v51 = vsel %vm93_vm13, %v912_v10, %v4069_v43  ;;  %v1012_v55 = vsel %vm94_vm14, %v912_v10, %v4070_v30  ;;  %v1102_v49 = vmul.f32 %v2437_v60, %v1010_v6  ;;  %v1040_v39 = vsel %vm92_vm12, %v952_v54, %v4071_v8  ;;  %1276 = vst [vmem:[#allocation2 + $0xc0] sm:$0xff] %v1201_v50  ;;  %v4074_v10 = vld [vmem:[#allocation71_spill] sm:$0xff]  ;;  %v4077_v24 = vld [vmem:[#allocation65_spill] sm:$0xff] }
 0x195   :  { %1277 = vst [vmem:[#allocation2 + $0xc8] sm:$0xff] %v1202_v25  ;;  %1278 = vst [vmem:[#allocation2 + $0xd0] sm:$0xff] %v1203_v20  ;;  %v1103_v4 = vmul.f32 %v2451_v32, %v1011_v51  ;;  %v1104_v12 = vmul.f32 %v2453_v42, %v1012_v55  ;;  %v1041_v22 = vsel %vm93_vm13, %v952_v54, %v4072_v17  ;;  %v920_v20 = vpop.permute.xlu1 %919  ;;  %v4075_v51 = vld [vmem:[#allocation72_spill] sm:$0xff]  ;;  %v4076_v55 = vld [vmem:[#allocation73_spill] sm:$0xff] }
 0x196   :  { %v1042_v30 = vsel %vm94_vm14, %v952_v54, %v4073_v18  ;;  %v1177_v6 = vadd.f32 %v1102_v49, %v4074_v10  ;;  %v1132_v43 = vmul.f32 %v2437_v60, %v1040_v39  ;;  %v1133_v50 = vmul.f32 %v2451_v32, %v1041_v22  ;;  %v960_v49 = vpop.permute.xlu0 %959 }
 0x197   :  { %v1134_v25 = vmul.f32 %v2453_v42, %v1042_v30  ;;  %v1178_v8 = vadd.f32 %v1103_v4, %v4075_v51  ;;  %v1179_v48 = vadd.f32 %v1104_v12, %v4076_v55  ;;  %v1016_v17 = vsel %vm92_vm12, %v920_v20, %v4077_v24  ;;  %v4079_v30 = vld [vmem:[#allocation47_spill] sm:$0xff] }
 0x198   :  { %v1017_v54 = vsel %vm93_vm13, %v920_v20, %v4078_v21  ;;  %1252 = vst [vmem:[#allocation2] sm:$0xff] %v1177_v6  ;;  %v1207_v39 = vadd.f32 %v1132_v43, %v3035_v35  ;;  %v1208_v22 = vadd.f32 %v1133_v50, %v3041_v34  ;;  %v1018_v4 = vsel %vm94_vm14, %v920_v20, %v3029_v31  ;;  %v4082_v50 = vld [vmem:[#allocation5_spill] sm:$0xff]  ;;  %v4083_v20 = vld [vmem:[#allocation30_spill] sm:$0xff] }
 0x199   :  { %v1209_v18 = vadd.f32 %v1134_v25, %v3047_v11  ;;  %1253 = vst [vmem:[#allocation2 + $0x8] sm:$0xff] %v1178_v8  ;;  %1254 = vst [vmem:[#allocation2 + $0x10] sm:$0xff] %v1179_v48  ;;  %v1108_v24 = vmul.f32 %v2437_v60, %v1016_v17  ;;  %v1109_v12 = vmul.f32 %v2451_v32, %v1017_v54  ;;  %v4080_v11 = vld [vmem:[#allocation22_spill] sm:$0xff]  ;;  %v4081_v48 = vld [vmem:[#allocation92_spill] sm:$0xff]  ;;  %v924_v43 = vpop.permute.xlu1 %923 }
 0x19a   :  { %v1110_v21 = vmul.f32 %v2453_v42, %v1018_v4  ;;  %v1046_v35 = vsel %vm92_vm12, %v960_v49, %v4079_v30  ;;  %v3447_v34 = vsel %vm97_vm11, %v4066_v59, %v3197_v15  ;;  %1282 = vst [vmem:[#allocation2 + $0xf0] sm:$0xff] %v1207_v39  ;;  %1283 = vst [vmem:[#allocation2 + $0xf8] sm:$0xff] %v1208_v22  ;;  %v4084_v15 = vld [vmem:[#allocation74_spill] sm:$0xff]  ;;  %v968_v55 = vpop.permute.xlu0 %967 }
 0x19b   :  { %1284 = vst [vmem:[#allocation2 + $0x100] sm:$0xff] %v1209_v18  ;;  %v1047_v31 = vsel %vm93_vm13, %v960_v49, %v4080_v11  ;;  %v1048_v10 = vsel %vm94_vm14, %v960_v49, %v4081_v48  ;;  %v1138_v6 = vmul.f32 %v2437_v60, %v1046_v35  ;;  %v1183_v25 = vadd.f32 %v1108_v24, %v4082_v50  ;;  %v4085_v39 = vld [vmem:[#allocation6_spill] sm:$0xff]  ;;  %v4087_v35 = vld [vmem:[#allocation49_spill] sm:$0xff]  ;;  %v4088_v11 = vld [vmem:[#allocation23_spill] sm:$0xff] }
 0x19c   :  { %v1184_v51 = vadd.f32 %v1109_v12, %v4083_v20  ;;  %v1185_v59 = vadd.f32 %v1110_v21, %v4084_v15  ;;  %v1139_v8 = vmul.f32 %v2451_v32, %v1047_v31  ;;  %v1140_v17 = vmul.f32 %v2453_v42, %v1048_v10  ;;  %v4086_v4 = vld [vmem:[#allocation42_spill] sm:$0xff]  ;;  %v4089_v48 = vld [vmem:[#allocation31_spill] sm:$0xff]  ;;  %v4091_v50 = vld [vmem:[#allocation93_spill] sm:$0xff] }
 0x19d   :  { %v1213_v54 = vadd.f32 %v1138_v6, %v3071_v9  ;;  %v1019_v49 = vsel %vm92_vm12, %v924_v43, %v4085_v39  ;;  %v1020_v22 = vsel %vm93_vm13, %v924_v43, %v3059_v3  ;;  %1258 = vst [vmem:[#allocation2 + $0x30] sm:$0xff] %v1183_v25  ;;  %v1021_v24 = vsel %vm94_vm14, %v924_v43, %v4086_v4  ;;  %v932_v31 = vpop.permute.xlu1 %931  ;;  %v4090_v6 = vld [vmem:[#allocation75_spill] sm:$0xff]  ;;  %v4093_v39 = vld [vmem:[#allocation44_spill] sm:$0xff] }
 0x19e   :  { %1259 = vst [vmem:[#allocation2 + $0x38] sm:$0xff] %v1184_v51  ;;  %1260 = vst [vmem:[#allocation2 + $0x40] sm:$0xff] %v1185_v59  ;;  %v1214_v18 = vadd.f32 %v1139_v8, %v3079_v2  ;;  %v1111_v12 = vmul.f32 %v2437_v60, %v1019_v49  ;;  %v1112_v9 = vmul.f32 %v2451_v32, %v1020_v22  ;;  %v976_v20 = vpop.permute.xlu0 %975  ;;  %v4092_v51 = vld [vmem:[#allocation76_spill] sm:$0xff] }
 0x19f   :  { %v1215_v21 = vadd.f32 %v1140_v17, %v3085_v56  ;;  %1288 = vst [vmem:[#allocation2 + $0x120] sm:$0xff] %v1213_v54  ;;  %v1113_v30 = vmul.f32 %v2453_v42, %v1021_v24  ;;  %v1052_v3 = vsel %vm92_vm12, %v968_v55, %v4087_v35  ;;  %v1053_v2 = vsel %vm93_vm13, %v968_v55, %v4088_v11  ;;  %v4098_v11 = vld [vmem:[#allocation32_spill] sm:$0xff] }
 0x1a0   :  { %1289 = vst [vmem:[#allocation2 + $0x128] sm:$0xff] %v1214_v18  ;;  %v1186_v10 = vadd.f32 %v1111_v12, %v4089_v48  ;;  %v1187_v43 = vadd.f32 %v1112_v9, %v4090_v6  ;;  %v1054_v56 = vsel %vm94_vm14, %v968_v55, %v4091_v50  ;;  %v1144_v25 = vmul.f32 %v2437_v60, %v1052_v3  ;;  %v4094_v12 = vld [vmem:[#allocation7_spill] sm:$0xff]  ;;  %v4097_v3 = vld [vmem:[#allocation94_spill] sm:$0xff] }
 0x1a1   :  { %1290 = vst [vmem:[#allocation2 + $0x130] sm:$0xff] %v1215_v21  ;;  %v1188_v15 = vadd.f32 %v1113_v30, %v4092_v51  ;;  %v1145_v59 = vmul.f32 %v2451_v32, %v1053_v2  ;;  %v1146_v8 = vmul.f32 %v2453_v42, %v1054_v56  ;;  %v1025_v17 = vsel %vm92_vm12, %v932_v31, %v3091_v41  ;;  %v4095_v21 = vld [vmem:[#allocation51_spill] sm:$0xff]  ;;  %v4100_v50 = vld [vmem:[#allocation46_spill] sm:$0xff] }
 0x1a2   :  { %1261 = vst [vmem:[#allocation2 + $0x48] sm:$0xff] %v1186_v10  ;;  %1262 = vst [vmem:[#allocation2 + $0x50] sm:$0xff] %v1187_v43  ;;  %v1219_v54 = vadd.f32 %v1144_v25, %v3109_v63  ;;  %v1026_v55 = vsel %vm93_vm13, %v932_v31, %v4093_v39  ;;  %v1027_v49 = vsel %vm94_vm14, %v932_v31, %v3103_v23  ;;  %v940_v63 = vpop.permute.xlu1 %939  ;;  %v4096_v23 = vld [vmem:[#allocation24_spill] sm:$0xff]  ;;  %v4099_v31 = vld [vmem:[#allocation77_spill] sm:$0xff] }
 0x1a3   :  { %v1117_v22 = vmul.f32 %v2437_v60, %v1025_v17  ;;  %1263 = vst [vmem:[#allocation2 + $0x58] sm:$0xff] %v1188_v15  ;;  %v1220_v18 = vadd.f32 %v1145_v59, %v3115_v45  ;;  %v1221_v4 = vadd.f32 %v1146_v8, %v3121_v40  ;;  %v1118_v41 = vmul.f32 %v2451_v32, %v1026_v55  ;;  %v984_v45 = vpop.permute.xlu0 %983  ;;  %v4101_v25 = vld [vmem:[#allocation48_spill] sm:$0xff]  ;;  %v4102_v59 = vld [vmem:[#allocation99_spill] sm:$0xff] }
 0x1a4   :  { %v1119_v24 = vmul.f32 %v2453_v42, %v1027_v49  ;;  %1294 = vst [vmem:[#allocation2 + $0x150] sm:$0xff] %v1219_v54  ;;  %v1058_v30 = vsel %vm92_vm12, %v976_v20, %v4095_v21  ;;  %v1059_v35 = vsel %vm93_vm13, %v976_v20, %v4096_v23  ;;  %v1060_v40 = vsel %vm94_vm14, %v976_v20, %v4097_v3 }
 0x1a5   :  { %v1192_v9 = vadd.f32 %v1117_v22, %v4094_v12  ;;  %1295 = vst [vmem:[#allocation2 + $0x158] sm:$0xff] %v1220_v18  ;;  %1296 = vst [vmem:[#allocation2 + $0x160] sm:$0xff] %v1221_v4  ;;  %v1193_v2 = vadd.f32 %v1118_v41, %v4098_v11  ;;  %v1150_v10 = vmul.f32 %v2437_v60, %v1058_v30  ;;  %v4103_v22 = vld [vmem:[#allocation53_spill] sm:$0xff]  ;;  %v4105_v41 = vld [vmem:[#allocation8_spill] sm:$0xff] }
 0x1a6   :  { %v1194_v48 = vadd.f32 %v1119_v24, %v4099_v31  ;;  %v1151_v6 = vmul.f32 %v2451_v32, %v1059_v35  ;;  %v1152_v43 = vmul.f32 %v2453_v42, %v1060_v40  ;;  %v1031_v56 = vsel %vm92_vm12, %v940_v63, %v4100_v50  ;;  %v948_v39 = vpop.permute.xlu1 %947  ;;  %v4108_v30 = vld [vmem:[#allocation78_spill] sm:$0xff]  ;;  %v4110_v31 = vld [vmem:[#allocation100_spill] sm:$0xff] }
 0x1a7   :  { %1267 = vst [vmem:[#allocation2 + $0x78] sm:$0xff] %v1192_v9  ;;  %v1032_v20 = vsel %vm93_vm13, %v940_v63, %v4101_v25  ;;  %v1033_v51 = vsel %vm94_vm14, %v940_v63, %v3141_v38  ;;  %1268 = vst [vmem:[#allocation2 + $0x80] sm:$0xff] %v1193_v2  ;;  %v1225_v15 = vadd.f32 %v1150_v10, %v3147_v13  ;;  %v4104_v38 = vld [vmem:[#allocation25_spill] sm:$0xff]  ;;  %v992_v13 = vpop.permute.xlu0 %991  ;;  %v4107_v9 = vld [vmem:[#allocation95_spill] sm:$0xff] }
 0x1a8   :  { %1269 = vst [vmem:[#allocation2 + $0x88] sm:$0xff] %v1194_v48  ;;  %v1226_v8 = vadd.f32 %v1151_v6, %v4102_v59  ;;  %v1123_v17 = vmul.f32 %v2437_v60, %v1031_v56  ;;  %v1124_v54 = vmul.f32 %v2451_v32, %v1032_v20  ;;  %v1227_v55 = vadd.f32 %v1152_v43, %v3159_v1  ;;  %v4106_v63 = vld [vmem:[#allocation33_spill] sm:$0xff]  ;;  %v4109_v40 = vld [vmem:[#allocation50_spill] sm:$0xff]  ;;  %v4114_v59 = vld [vmem:[#allocation55_spill] sm:$0xff] }
 0x1a9   :  { %v1125_v49 = vmul.f32 %v2453_v42, %v1033_v51  ;;  %v1064_v18 = vsel %vm92_vm12, %v984_v45, %v4103_v22  ;;  %v1065_v4 = vsel %vm93_vm13, %v984_v45, %v4104_v38  ;;  %1300 = vst [vmem:[#allocation2 + $0x180] sm:$0xff] %v1225_v15  ;;  %v1066_v1 = vsel %vm94_vm14, %v984_v45, %v4107_v9  ;;  %v4111_v48 = vld [vmem:[#allocation101_spill] sm:$0xff]  ;;  %v4112_v56 = vld [vmem:[#allocation102_spill] sm:$0xff]  ;;  %v4120_v9 = vld [vmem:[#allocation103_spill] sm:$0xff] }
 0x1aa   :  { %1301 = vst [vmem:[#allocation2 + $0x188] sm:$0xff] %v1226_v8  ;;  %v1198_v24 = vadd.f32 %v1123_v17, %v4105_v41  ;;  %v1199_v12 = vadd.f32 %v1124_v54, %v4106_v63  ;;  %v1156_v21 = vmul.f32 %v2437_v60, %v1064_v18  ;;  %1302 = vst [vmem:[#allocation2 + $0x190] sm:$0xff] %v1227_v55  ;;  %v956_v43 = vpop.permute.xlu1 %955  ;;  %v4113_v51 = vld [vmem:[#allocation9_spill] sm:$0xff]  ;;  %v4115_v17 = vld [vmem:[#allocation26_spill] sm:$0xff] }
 0x1ab   :  { %v1200_v23 = vadd.f32 %v1125_v49, %v4108_v30  ;;  %v1157_v35 = vmul.f32 %v2451_v32, %v1065_v4  ;;  %v1158_v3 = vmul.f32 %v2453_v42, %v1066_v1  ;;  %v1037_v11 = vsel %vm92_vm12, %v948_v39, %v4109_v40  ;;  %v1000_v55 = vpop.permute.xlu0 %999  ;;  %v4117_v49 = vld [vmem:[#allocation34_spill] sm:$0xff]  ;;  %v4118_v18 = vld [vmem:[#allocation79_spill] sm:$0xff]  ;;  %v4119_v63 = vld [vmem:[#allocation52_spill] sm:$0xff] }
 0x1ac   :  { %1273 = vst [vmem:[#allocation2 + $0xa8] sm:$0xff] %v1198_v24  ;;  %1274 = vst [vmem:[#allocation2 + $0xb0] sm:$0xff] %v1199_v12  ;;  %v1231_v2 = vadd.f32 %v1156_v21, %v3192_v5  ;;  %v1038_v45 = vsel %vm93_vm13, %v948_v39, %v4110_v31  ;;  %v1039_v10 = vsel %vm94_vm14, %v948_v39, %v4111_v48  ;;  %v4116_v39 = vld [vmem:[#allocation96_spill] sm:$0xff]  ;;  %v4124_v48 = vld [vmem:[#allocation35_spill] sm:$0xff] }
 0x1ad   :  { %v1129_v6 = vmul.f32 %v2437_v60, %v1037_v11  ;;  %1275 = vst [vmem:[#allocation2 + $0xb8] sm:$0xff] %v1200_v23  ;;  %v1232_v50 = vadd.f32 %v1157_v35, %v3203_v19  ;;  %v1233_v25 = vadd.f32 %v1158_v3, %v4112_v56  ;;  %v1130_v20 = vmul.f32 %v2451_v32, %v1038_v45 }
 0x1ae   :  { %v1131_v5 = vmul.f32 %v2453_v42, %v1039_v10  ;;  %1306 = vst [vmem:[#allocation2 + $0x1b0] sm:$0xff] %v1231_v2  ;;  %v1070_v8 = vsel %vm92_vm12, %v992_v13, %v4114_v59  ;;  %v1071_v54 = vsel %vm93_vm13, %v992_v13, %v4115_v17  ;;  %v1072_v19 = vsel %vm94_vm14, %v992_v13, %v4116_v39  ;;  %v964_v21 = vpop.permute.xlu1 %963  ;;  %v4121_v2 = vld [vmem:[#allocation57_spill] sm:$0xff] }
 0x1af   :  { %v1204_v15 = vadd.f32 %v1129_v6, %v4113_v51  ;;  %1307 = vst [vmem:[#allocation2 + $0x1b8] sm:$0xff] %v1232_v50  ;;  %1308 = vst [vmem:[#allocation2 + $0x1c0] sm:$0xff] %v1233_v25  ;;  %v1205_v22 = vadd.f32 %v1130_v20, %v4117_v49  ;;  %v1162_v4 = vmul.f32 %v2437_v60, %v1070_v8  ;;  %v4125_v6 = vld [vmem:[#allocation97_spill] sm:$0xff]  ;;  %v4126_v50 = vld [vmem:[#allocation80_spill] sm:$0xff]  ;;  %v1008_v51 = vpop.permute.xlu0 %1007 }
 0x1b0   :  { %v1206_v38 = vadd.f32 %v1131_v5, %v4118_v18  ;;  %v1163_v41 = vmul.f32 %v2451_v32, %v1071_v54  ;;  %v1164_v24 = vmul.f32 %v2453_v42, %v1072_v19  ;;  %v1043_v12 = vsel %vm92_vm12, %v956_v43, %v4119_v63  ;;  %v4129_v18 = vld [vmem:[#allocation28_spill] sm:$0xff] }
 0x1b1   :  { %1279 = vst [vmem:[#allocation2 + $0xd8] sm:$0xff] %v1204_v15  ;;  %v1044_v13 = vsel %vm93_vm13, %v956_v43, %v4120_v9  ;;  %v1045_v1 = vsel %vm94_vm14, %v956_v43, %v3227_v62  ;;  %1280 = vst [vmem:[#allocation2 + $0xe0] sm:$0xff] %v1205_v22  ;;  %v1237_v30 = vadd.f32 %v1162_v4, %v3233_v44  ;;  %v4122_v62 = vld [vmem:[#allocation27_spill] sm:$0xff]  ;;  %v4123_v44 = vld [vmem:[#allocation10_spill] sm:$0xff] }
 0x1b2   :  { %1281 = vst [vmem:[#allocation2 + $0xe8] sm:$0xff] %v1206_v38  ;;  %v1238_v23 = vadd.f32 %v1163_v41, %v3248_v16  ;;  %v1135_v35 = vmul.f32 %v2437_v60, %v1043_v12  ;;  %v1136_v3 = vmul.f32 %v2451_v32, %v1044_v13  ;;  %v1239_v40 = vadd.f32 %v1164_v24, %v3259_v57  ;;  %v972_v15 = vpop.permute.xlu1 %971  ;;  %v4128_v22 = vld [vmem:[#allocation59_spill] sm:$0xff]  ;;  %v4130_v38 = vld [vmem:[#allocation98_spill] sm:$0xff]  ;;  %v4132_v41 = vld [vmem:[#allocation81_spill] sm:$0xff] }
 0x1b3   :  { %v1137_v11 = vmul.f32 %v2453_v42, %v1045_v1  ;;  %v1076_v31 = vsel %vm92_vm12, %v1000_v55, %v4121_v2  ;;  %v1077_v45 = vsel %vm93_vm13, %v1000_v55, %v4122_v62  ;;  %1312 = vst [vmem:[#allocation2 + $0x1e0] sm:$0xff] %v1237_v30  ;;  %v1078_v57 = vsel %vm94_vm14, %v1000_v55, %v4125_v6  ;;  %v4133_v2 = vld [vmem:[#allocation15_spill] sm:$0xff] }
 0x1b4   :  { %1313 = vst [vmem:[#allocation2 + $0x1e8] sm:$0xff] %v1238_v23  ;;  %v1210_v16 = vadd.f32 %v1135_v35, %v4123_v44  ;;  %v1211_v10 = vadd.f32 %v1136_v3, %v4124_v48  ;;  %v1168_v43 = vmul.f32 %v2437_v60, %v1076_v31  ;;  %1314 = vst [vmem:[#allocation2 + $0x1f0] sm:$0xff] %v1239_v40  ;;  %v4135_v31 = vld [vmem:[#allocation82_spill] sm:$0xff]  ;;  %v4137_v48 = vld [vmem:[#allocation83_spill] sm:$0xff] }
 0x1b5   :  { %v1212_v56 = vadd.f32 %v1137_v11, %v4126_v50  ;;  %v1169_v25 = vmul.f32 %v2451_v32, %v1077_v45  ;;  %v1170_v20 = vmul.f32 %v2453_v42, %v1078_v57  ;;  %v1049_v5 = vsel %vm92_vm12, %v964_v21, %v3265_v58  ;;  %v4136_v45 = vld [vmem:[#allocation17_spill] sm:$0xff]  ;;  %v4138_v57 = vld [vmem:[#allocation39_spill] sm:$0xff] }
 0x1b6   :  { %1285 = vst [vmem:[#allocation2 + $0x108] sm:$0xff] %v1210_v16  ;;  %1286 = vst [vmem:[#allocation2 + $0x110] sm:$0xff] %v1211_v10  ;;  %v1243_v59 = vadd.f32 %v1168_v43, %v3283_v53  ;;  %v1050_v8 = vsel %vm93_vm13, %v964_v21, %v3271_v46  ;;  %v1051_v17 = vsel %vm94_vm14, %v964_v21, %v3277_v37  ;;  %v4127_v53 = vld [vmem:[#allocation11_spill] sm:$0xff]  ;;  %v980_v9 = vpop.permute.xlu1 %979  ;;  %v4139_v50 = vld [vmem:[#allocation13_spill] sm:$0xff] }
 0x1b7   :  { %v1141_v54 = vmul.f32 %v2437_v60, %v1049_v5  ;;  %1287 = vst [vmem:[#allocation2 + $0x118] sm:$0xff] %v1212_v56  ;;  %v1244_v39 = vadd.f32 %v1169_v25, %v3292_v61  ;;  %v1245_v58 = vadd.f32 %v1170_v20, %v3307_v27  ;;  %v1142_v19 = vmul.f32 %v2451_v32, %v1050_v8  ;;  %v4131_v27 = vld [vmem:[#allocation36_spill] sm:$0xff]  ;;  %v4140_v25 = vld [vmem:[#allocation18_spill] sm:$0xff]  ;;  %v4142_v8 = vld [vmem:[#allocation85_spill] sm:$0xff] }
 0x1b8   :  { %v1143_v55 = vmul.f32 %v2453_v42, %v1051_v17  ;;  %1318 = vst [vmem:[#allocation2 + $0x210] sm:$0xff] %v1243_v59  ;;  %v1082_v46 = vsel %vm92_vm12, %v1008_v51, %v4128_v22  ;;  %v1083_v37 = vsel %vm93_vm13, %v1008_v51, %v4129_v18  ;;  %v1084_v61 = vsel %vm94_vm14, %v1008_v51, %v4130_v38  ;;  %v4146_v18 = vld [vmem:[#allocation88_spill] sm:$0xff]  ;;  %v4147_v38 = vld [vmem:[#allocation89_spill] sm:$0xff] }
 0x1b9   :  { %v1216_v49 = vadd.f32 %v1141_v54, %v4127_v53  ;;  %1319 = vst [vmem:[#allocation2 + $0x218] sm:$0xff] %v1244_v39  ;;  %1320 = vst [vmem:[#allocation2 + $0x220] sm:$0xff] %v1245_v58  ;;  %v1217_v4 = vadd.f32 %v1142_v19, %v4131_v27  ;;  %v1174_v63 = vmul.f32 %v2437_v60, %v1082_v46  ;;  %v4143_v58 = vld [vmem:[#allocation104_spill] sm:$0xff]  ;;  %v4144_v19 = vld [vmem:[#allocation62_spill] sm:$0xff] }
 0x1ba   :  { %v1218_v24 = vadd.f32 %v1143_v55, %v4132_v41  ;;  %v1175_v12 = vmul.f32 %v2451_v32, %v1083_v37  ;;  %v1176_v13 = vmul.f32 %v2453_v42, %v1084_v61  ;;  %v1055_v1 = vsel %vm92_vm12, %v972_v15, %v3318_v29  ;;  %v988_v16 = vpop.permute.xlu1 %987  ;;  %v4148_v41 = vld [vmem:[#allocation66_spill] sm:$0xff] }
 0x1bb   :  { %1291 = vst [vmem:[#allocation2 + $0x138] sm:$0xff] %v1216_v49  ;;  %v1056_v21 = vsel %vm93_vm13, %v972_v15, %v3324_v14  ;;  %v1057_v30 = vsel %vm94_vm14, %v972_v15, %v3330_v28  ;;  %1292 = vst [vmem:[#allocation2 + $0x140] sm:$0xff] %v1217_v4  ;;  %v1249_v23 = vadd.f32 %v1174_v63, %v3336_v33  ;;  %v4134_v33 = vld [vmem:[#allocation12_spill] sm:$0xff]  ;;  %v4145_v49 = vld [vmem:[#allocation87_spill] sm:$0xff] }
 0x1bc   :  { %1293 = vst [vmem:[#allocation2 + $0x148] sm:$0xff] %v1218_v24  ;;  %v1250_v35 = vadd.f32 %v1175_v12, %v3342_v47  ;;  %v1147_v3 = vmul.f32 %v2437_v60, %v1055_v1  ;;  %v1148_v40 = vmul.f32 %v2451_v32, %v1056_v21  ;;  %v1251_v29 = vadd.f32 %v1176_v13, %v3351_v0  ;;  %v4141_v15 = vld [vmem:[#allocation84_spill] sm:$0xff]  ;;  %v4149_v24 = vld [vmem:[#allocation37_spill] sm:$0xff]  ;;  %v4150_v1 = vld [vmem:[#allocation67_spill] sm:$0xff] }
 0x1bd   :  { %v1149_v11 = vmul.f32 %v2453_v42, %v1057_v30  ;;  %v1061_v14 = vsel %vm92_vm12, %v980_v9, %v3366_v52  ;;  %v1062_v28 = vsel %vm93_vm13, %v980_v9, %v4133_v2  ;;  %1324 = vst [vmem:[#allocation2 + $0x240] sm:$0xff] %v1249_v23  ;;  %v1063_v0 = vsel %vm94_vm14, %v980_v9, %v4136_v45  ;;  %v4151_v30 = vld [vmem:[#allocation68_spill] sm:$0xff] }
 0x1be   :  { %1325 = vst [vmem:[#allocation2 + $0x248] sm:$0xff] %v1250_v35  ;;  %v1222_v47 = vadd.f32 %v1147_v3, %v4134_v33  ;;  %v1223_v62 = vadd.f32 %v1148_v40, %v4135_v31  ;;  %v1153_v44 = vmul.f32 %v2437_v60, %v1061_v14  ;;  %1326 = vst [vmem:[#allocation2 + $0x250] sm:$0xff] %v1251_v29  ;;  %v996_v46 = vpop.permute.xlu1 %995  ;;  %v4152_v35 = vld [vmem:[#allocation54_spill] sm:$0xff]  ;;  %v4153_v3 = vld [vmem:[#allocation64_spill] sm:$0xff] }
 0x1bf   :  { %v1224_v52 = vadd.f32 %v1149_v11, %v4137_v48  ;;  %v1154_v10 = vmul.f32 %v2451_v32, %v1062_v28  ;;  %v1155_v6 = vmul.f32 %v2453_v42, %v1063_v0  ;;  %v1067_v43 = vsel %vm92_vm12, %v988_v16, %v4138_v57  ;;  %v4154_v0 = vld [vmem:[#allocation29_spill] sm:$0xff]  ;;  %v4157_v57 = vld [vmem:[#allocation38_spill] sm:$0xff] }
 0x1c0   :  { %1297 = vst [vmem:[#allocation2 + $0x168] sm:$0xff] %v1222_v47  ;;  %1298 = vst [vmem:[#allocation2 + $0x170] sm:$0xff] %v1223_v62  ;;  %v1228_v56 = vadd.f32 %v1153_v44, %v4139_v50  ;;  %v1068_v20 = vsel %vm93_vm13, %v988_v16, %v4140_v25  ;;  %v1069_v5 = vsel %vm94_vm14, %v988_v16, %v3447_v34  ;;  %v4155_v44 = vld [vmem:[#allocation14_spill] sm:$0xff] }
 0x1c1   :  { %v1159_v51 = vmul.f32 %v2437_v60, %v1067_v43  ;;  %1299 = vst [vmem:[#allocation2 + $0x178] sm:$0xff] %v1224_v52  ;;  %v1229_v59 = vadd.f32 %v1154_v10, %v4141_v15  ;;  %v1230_v17 = vadd.f32 %v1155_v6, %v4142_v8  ;;  %v1160_v54 = vmul.f32 %v2451_v32, %v1068_v20  ;;  %v4156_v6 = vld [vmem:[#allocation69_spill] sm:$0xff]  ;;  %v4158_v50 = vld [vmem:[#allocation70_spill] sm:$0xff] }
 0x1c2   :  { %v1161_v39 = vmul.f32 %v2453_v42, %v1069_v5  ;;  %v898_v55 = vsel %vm95_vm9, %v4144_v19, %v4143_v58  ;;  %v899_v34 = vsel %vm96_vm10, %v4144_v19, %v4143_v58  ;;  %v900_v53 = vsel %vm97_vm11, %v4144_v19, %v4143_v58  ;;  %1303 = vst [vmem:[#allocation2 + $0x198] sm:$0xff] %v1228_v56  ;;  %v1004_v33 = vpop.permute.xlu1 %1003 }
 0x1c3   :  { %v1234_v22 = vadd.f32 %v1159_v51, %v4145_v49  ;;  %1304 = vst [vmem:[#allocation2 + $0x1a0] sm:$0xff] %v1229_v59  ;;  %1305 = vst [vmem:[#allocation2 + $0x1a8] sm:$0xff] %v1230_v17  ;;  %v1235_v37 = vadd.f32 %v1160_v54, %v4146_v18  ;;  %v1073_v27 = vsel %vm92_vm12, %v996_v46, %v898_v55 }
 0x1c4   :  { %v1236_v61 = vadd.f32 %v1161_v39, %v4147_v38  ;;  %v1074_v4 = vsel %vm93_vm13, %v996_v46, %v899_v34  ;;  %v573_v63 = vsel %vm92_vm12, %v4149_v24, %v4148_v41  ;;  %v1075_v12 = vsel %vm94_vm14, %v996_v46, %v900_v53 }
 0x1c5   :  { %1309 = vst [vmem:[#allocation2 + $0x1c8] sm:$0xff] %v1234_v22  ;;  %v1165_v9 = vmul.f32 %v2437_v60, %v1073_v27  ;;  %v1166_v13 = vmul.f32 %v2451_v32, %v1074_v4  ;;  %v574_v21 = vsel %vm93_vm13, %v4149_v24, %v4150_v1  ;;  %v575_v23 = vsel %vm94_vm14, %v4149_v24, %v4151_v30 }
 0x1c6   :  { %v904_v40 = vsel %vm95_vm9, %v4153_v3, %v4152_v35  ;;  %1310 = vst [vmem:[#allocation2 + $0x1d0] sm:$0xff] %v1235_v37  ;;  %1311 = vst [vmem:[#allocation2 + $0x1d8] sm:$0xff] %v1236_v61  ;;  %v1167_v29 = vmul.f32 %v2453_v42, %v1075_v12  ;;  %v905_v11 = vsel %vm96_vm10, %v4153_v3, %v4152_v35 }
 0x1c7   :  { %v906_v14 = vsel %vm97_vm11, %v4153_v3, %v4152_v35  ;;  %v1240_v2 = vadd.f32 %v1165_v9, %v573_v63  ;;  %v1241_v28 = vadd.f32 %v1166_v13, %v574_v21  ;;  %v1079_v31 = vsel %vm92_vm12, %v1004_v33, %v904_v40 }
 0x1c8   :  { %v1242_v47 = vadd.f32 %v1167_v29, %v575_v23  ;;  %v1080_v62 = vsel %vm93_vm13, %v1004_v33, %v905_v11  ;;  %v1081_v45 = vsel %vm94_vm14, %v1004_v33, %v906_v14  ;;  %v400_v16 = vsel %vm97_vm11, %v4155_v44, %v4154_v0 }
 0x1c9   :  { %1315 = vst [vmem:[#allocation2 + $0x1f8] sm:$0xff] %v1240_v2  ;;  %1316 = vst [vmem:[#allocation2 + $0x200] sm:$0xff] %v1241_v28  ;;  %v1171_v48 = vmul.f32 %v2437_v60, %v1079_v31  ;;  %v1172_v52 = vmul.f32 %v2451_v32, %v1080_v62  ;;  %v1173_v10 = vmul.f32 %v2453_v42, %v1081_v45 }
 0x1ca   :  { %v579_v43 = vsel %vm92_vm12, %v4157_v57, %v4156_v6  ;;  %v580_v56 = vsel %vm93_vm13, %v4157_v57, %v4158_v50  ;;  %v581_v25 = vsel %vm94_vm14, %v4157_v57, %v400_v16  ;;  %1317 = vst [vmem:[#allocation2 + $0x208] sm:$0xff] %v1242_v47 }
 0x1cb   :  { %v1246_v60 = vadd.f32 %v1171_v48, %v579_v43  ;;  %v1247_v20 = vadd.f32 %v1172_v52, %v580_v56  ;;  %v1248_v32 = vadd.f32 %v1173_v10, %v581_v25 }
 0x1cd   :  { %1321 = vst [vmem:[#allocation2 + $0x228] sm:$0xff] %v1246_v60  ;;  %1322 = vst [vmem:[#allocation2 + $0x230] sm:$0xff] %v1247_v20 }
 0x1ce   :  { %1323 = vst [vmem:[#allocation2 + $0x238] sm:$0xff] %v1248_v32 }
 0x1cf   :  { %1375 = shalt.err (!%p1372_p4)
}
 0x1d0   :  { %s1376_s7 = scalar_lea.hbm %s3773_s3, 9600 }
 0x1d1   :  { %p1377_p5 = scmp.ne.s32.totalorder %s3773_s3, %s1376_s7  ;;  %p1380_p6 = scmp.lt.u32.totalorder %s1376_s7, %s3773_s3 }
 0x1d3   :  { %p1382_p7 = pnand %p1380_p6, %p1377_p5 }
 0x1d5   :  { %1385 = shalt.err (!%p1382_p7)
}
 0x1d6   :  { %s1392_s0 = smov 384   ;;  %s1393_s12 = smov 24  }
 0x1d7   :  { %1338 = dma.vmem_to_hbm [thread:$0]  %s1333_s30, 9600, %s3773_s3, [#allocation3], %s1392_s0, %s1392_s0, %s1393_s12  }
 0x1d8   :  { %1386 = dma.done.wait [#allocation3], 9600  }
 0x1d9   :  { %1387 = vsyncadd [#allocation3], 4294957696 }
 0x1da   :  { %1342 = vsyncpa [#allocation3], 1 }

</bundles_post_ra>
